<compile_context>
chip_gen: v7x
topology: tpu7x:2x2x1
jax: 0.10.0
libtpu: 0.0.40
codegen_flags: <defaults>
</compile_context>

<pallas_src>
import jax
import jax.numpy as jnp
from jax.experimental import pallas as pl
from jax.experimental.pallas import tpu as pltpu


def _round_up(x, m):
    return (x + m - 1) // m * m


def _make_vdsr_kernel(W, C, n_hidden, Q, S, K_pad):
    """Fused VDSR kernel. Grid = (batch, layer).

    refs (in order):
      x_ref     : (1, 1, Q)       f32   flat zero-padded input row (resident per n)
      w_ref     : (1, C, K_pad)   bf16  layer-l transposed conv weights
      b_ref     : (1, C, 1)       f32   layer-l bias (per output channel)
      w_out_ref : (8, K_pad)      bf16  output-conv weights (row 0 real)
      b_out_ref : (1, 1)          f32   output-conv bias
      mask_ref  : (1, Q)          f32   interior mask over flat padded coords
      o_ref     : (1, 1, Q)       f32   flat padded output row
      slab_ref  : (C, P_ext)      bf16  persistent activation slab (+ halo/margin)
      patch_ref : (K_pad, Q)      bf16  persistent im2col patch scratch
    """
    Wp = W + 2
    K = 9 * C
    bf16 = jnp.bfloat16
    f32 = jnp.float32
    # Static lane offsets of the 9 taps into the extended slab; tap t = dy*3+dx.
    tap_off = [S + (dy - 1) * Wp + (dx - 1) for dy in range(3) for dx in range(3)]

    def build_patch(slab, patch_ref):
        # slab: (C, P_ext) bf16 value. Writes the (9C, Q) im2col patch: rows
        # [t*C:(t+1)*C] hold the activation shifted by tap t.
        for t, off in enumerate(tap_off):
            patch_ref[t * C:(t + 1) * C, :] = slab[:, off:off + Q]

    def kernel(x_ref, w_ref, b_ref, w_out_ref, b_out_ref, mask_ref, o_ref,
               slab_ref, patch_ref):
        l = pl.program_id(1)

        @pl.when(l == 0)
        def _init():
            # Zero the slab once (halo / margins / tail stay zero for every
            # layer), seed channel 0 with the input image, and zero the
            # K-padding rows of the patch (read by every matmul).
            slab_ref[...] = jnp.zeros_like(slab_ref)
            slab_ref[0:1, S:S + Q] = x_ref[0].astype(bf16)
            if K_pad > K:
                patch_ref[K:, :] = jnp.zeros((K_pad - K, Q), bf16)

        # Hidden layer l: conv3x3(C->C) + bias + ReLU as ONE K=K_pad MXU matmul
        # with the spatial dim as the MXU output columns (N = Q lanes).
        build_patch(slab_ref[...], patch_ref)
        acc = jnp.dot(w_ref[0], patch_ref[...], preferred_element_type=f32)
        act = jnp.maximum(acc + b_ref[0], 0.0) * mask_ref[...]
        slab_ref[:, S:S + Q] = act.astype(bf16)          # 128-aligned lane store

        @pl.when(l == n_hidden - 1)
        def _output():
            # Output conv3x3(C->1) + bias + residual on the freshly written slab.
            build_patch(slab_ref[...], patch_ref)
            res = jnp.dot(w_out_ref[...], patch_ref[...],
                          preferred_element_type=f32)    # (8, Q); row 0 is real
            out = res[0:1, :] + b_out_ref[...] + x_ref[0]
            o_ref[0] = out.astype(o_ref.dtype)

    return kernel


@jax.jit
def vdsr_forward(x_nchw, params):
    """VDSR forward. x_nchw: (N, 1, H, W) f32 -> (N, 1, H, W) f32."""
    N, _, H, W = x_nchw.shape
    w_in, b_in = params[0]
    mids = params[1:-1]
    w_out, b_out = params[-1]
    C = w_in.shape[-1]
    n_hidden = 1 + len(mids)

    Hp, Wp = H + 2, W + 2
    P = Hp * Wp                          # flat padded spatial size
    Q = _round_up(P, 128)                # lane-dense spatial extent
    S = _round_up(Wp + 1, 128)           # slab lane offset of flat index 0
    P_ext = _round_up(S + Wp + 1 + Q, 128)
    K = 9 * C
    K_pad = _round_up(K, 128)

    # Lane-dense, flat zero-padded input rows: interior = x, halo/tail = 0.
    x_img = x_nchw[:, 0].astype(jnp.float32)                      # (N, H, W)
    x_pad = jnp.pad(x_img, ((0, 0), (1, 1), (1, 1))).reshape(N, P)
    x_flat = jnp.pad(x_pad, ((0, 0), (0, Q - P))).reshape(N, 1, Q)

    # Interior mask over flat padded coords (keeps halo/tail zero every layer).
    yy = jnp.arange(Hp)[:, None]
    xx = jnp.arange(Wp)[None, :]
    m = ((yy >= 1) & (yy <= H) & (xx >= 1) & (xx <= W)).astype(jnp.float32)
    mask = jnp.pad(m.reshape(1, P), ((0, 0), (0, Q - P)))          # (1, Q)

    # Weights packed for the transposed GEMM: row = c_out, col = t*C + c_in,
    # with tap t = dy*3 + dx; K zero-padded to K_pad.
    def pack(w_hwio):                                              # (3,3,C,C)->(C,K_pad)
        wt = jnp.transpose(w_hwio, (3, 0, 1, 2)).reshape(C, K)
        return jnp.pad(wt, ((0, 0), (0, K_pad - K)))

    # Fold the Cin=1 input conv into the uniform C->C machinery by
    # zero-expanding its weights; the kernel puts x in channel 0 of the slab.
    w0 = jnp.zeros((3, 3, C, C), jnp.float32).at[:, :, 0, :].set(w_in[:, :, 0, :])
    w_hid = jnp.stack([pack(w0)] + [pack(w) for w, _ in mids])     # (n_hidden,C,K_pad)
    w_hid = w_hid.astype(jnp.bfloat16)
    b_hid = jnp.stack([b_in] + [b for _, b in mids])               # (n_hidden, C)
    b_hid = b_hid.reshape(n_hidden, C, 1).astype(jnp.float32)

    w_out_row = jnp.transpose(w_out, (3, 0, 1, 2)).reshape(1, K)   # (1, 9C)
    w_out_row = jnp.pad(w_out_row, ((0, 7), (0, K_pad - K))).astype(jnp.bfloat16)
    b_out_r = b_out.reshape(1, 1).astype(jnp.float32)

    kernel = _make_vdsr_kernel(W, C, n_hidden, Q, S, K_pad)

    flops = N * (n_hidden * 2 * C * K_pad * Q + 2 * 8 * K_pad * Q)
    bytes_accessed = (x_flat.size * 4 + N * (w_hid.size * 2 + b_hid.size * 4)
                      + w_out_row.size * 2 + 4 + mask.size * 4 + N * Q * 4)

    out_flat = pl.pallas_call(
        kernel,
        out_shape=jax.ShapeDtypeStruct((N, 1, Q), jnp.float32),
        grid_spec=pltpu.PrefetchScalarGridSpec(
            num_scalar_prefetch=0,
            grid=(N, n_hidden),
            in_specs=[
                pl.BlockSpec((1, 1, Q), lambda n, l: (n, 0, 0)),       # x
                pl.BlockSpec((1, C, K_pad), lambda n, l: (l, 0, 0)),   # w_hid[l]
                pl.BlockSpec((1, C, 1), lambda n, l: (l, 0, 0)),       # b_hid[l]
                pl.BlockSpec((8, K_pad), lambda n, l: (0, 0)),         # w_out
                pl.BlockSpec((1, 1), lambda n, l: (0, 0)),             # b_out
                pl.BlockSpec((1, Q), lambda n, l: (0, 0)),             # mask
            ],
            out_specs=pl.BlockSpec((1, 1, Q), lambda n, l: (n, 0, 0)),
            scratch_shapes=[
                pltpu.VMEM((C, P_ext), jnp.bfloat16),                  # activation slab
                pltpu.VMEM((K_pad, Q), jnp.bfloat16),                  # im2col patch
            ],
        ),
        compiler_params=pltpu.CompilerParams(
            dimension_semantics=("parallel", "arbitrary")),
        cost_estimate=pl.CostEstimate(
            flops=flops, transcendentals=0, bytes_accessed=bytes_accessed),
    )(x_flat, w_hid, b_hid, w_out_row, b_out_r, mask)

    out = out_flat[:, 0, :P].reshape(N, Hp, Wp)[:, 1:1 + H, 1:1 + W]
    return out[:, None, :, :].astype(x_nchw.dtype)


def _conv3x3_ref(act, w):
    # bf16 operands + f32 accumulation: same numerics as the kernel's MXU path.
    return jax.lax.conv_general_dilated(
        act.astype(jnp.bfloat16), w.astype(jnp.bfloat16),
        window_strides=(1, 1), padding=((1, 1), (1, 1)),
        dimension_numbers=("NHWC", "HWIO", "NHWC"),
        preferred_element_type=jnp.float32)


def vdsr_reference(x_nchw, params):
    """Pure-XLA reference with matching bf16-operand / f32-accum convolutions."""
    x = jnp.transpose(x_nchw, (0, 2, 3, 1)).astype(jnp.float32)
    act = x
    for w, b in params[:-1]:
        act = jnp.maximum(_conv3x3_ref(act, w) + b, 0.0)
    w, b = params[-1]
    out = _conv3x3_ref(act, w) + b + x
    return jnp.transpose(out, (0, 3, 1, 2))


def init_vdsr_params(key, hidden=64):
    """Deterministic init mirroring the PyTorch module shapes (HWIO weights).

    inputConv : Conv2d(1  -> 64, k=3)   -> w (3,3,1,64),  b (64,)
    18x middle: Conv2d(64 -> 64, k=3)   -> w (3,3,64,64), b (64,)
    outputConv: Conv2d(64 -> 1,  k=3)   -> w (3,3,64,1),  b (1,)
    (Uniform(-1/sqrt(fan_in), 1/sqrt(fan_in)), matching PyTorch's default.)
    """
    def one_layer(k, cin, cout):
        kw, kb = jax.random.split(k)
        bound = 1.0 / jnp.sqrt(cin * 3.0 * 3.0)
        w = jax.random.uniform(kw, (3, 3, cin, cout), jnp.float32,
                               minval=-bound, maxval=bound)
        b = jax.random.uniform(kb, (cout,), jnp.float32,
                               minval=-bound, maxval=bound)
        return w, b

    keys = jax.random.split(key, 20)
    params = [one_layer(keys[0], 1, hidden)]                 # inputConv
    for i in range(18):
        params.append(one_layer(keys[1 + i], hidden, hidden))  # middleConvs
    params.append(one_layer(keys[19], hidden, 1))            # outputConv
    return params


if __name__ == "__main__":
    key = jax.random.PRNGKey(0)
    k_x, k_p = jax.random.split(key)

    # VDSR expects single-channel (luminance) images: (N, 1, H, W).
    x = jax.random.normal(k_x, (2, 1, 16, 16), jnp.float32)
    params = init_vdsr_params(k_p, hidden=64)

    y = vdsr_forward(x, params)
    jax.block_until_ready(y)

    assert y.shape == x.shape and y.dtype == x.dtype
    # Numerical check against the XLA reference (same bf16/f32 recipe).
    y_ref = vdsr_reference(x, params)
    assert float(jnp.max(jnp.abs(y - y_ref))) < 5e-2

    print("KERNEL_OK")
</pallas_src>

<mosaic_0001>
module attributes {stable_mosaic.version = 11 : i64} {
  func.func @kernel(%arg0: i32, %arg1: i32, %arg2: memref<1x1x384xf32, #tpu.memory_space<vmem>>, %arg3: memref<1x64x640xbf16, #tpu.memory_space<vmem>>, %arg4: memref<1x64x1xf32, #tpu.memory_space<vmem>>, %arg5: memref<8x640xbf16, #tpu.memory_space<vmem>>, %arg6: memref<1x1xf32, #tpu.memory_space<vmem>>, %arg7: memref<1x384xf32, #tpu.memory_space<vmem>>, %arg8: memref<1x1x384xf32, #tpu.memory_space<vmem>>, %arg9: memref<64x640xbf16, #tpu.memory_space<vmem>>, %arg10: memref<640x384xbf16, #tpu.memory_space<vmem>>) attributes {dimension_semantics = [#tpu.dimension_semantics<parallel>, #tpu.dimension_semantics<arbitrary>], iteration_bounds = array<i64: 2, 19>, scalar_prefetch = 0 : i64, scratch_operands = 2 : i64, tpu.core_type = #tpu.core_type<tc>, window_params = [{transform_indices = @transform_0, window_bounds = array<i64: 1, 1, 384>}, {transform_indices = @transform_1, window_bounds = array<i64: 1, 64, 640>}, {transform_indices = @transform_2, window_bounds = array<i64: 1, 64, 1>}, {pipeline_mode = #tpu.pipeline_mode<synchronous>, transform_indices = @transform_3, window_bounds = array<i64: 8, 640>}, {pipeline_mode = #tpu.pipeline_mode<synchronous>, transform_indices = @transform_4, window_bounds = array<i64: 1, 1>}, {pipeline_mode = #tpu.pipeline_mode<synchronous>, transform_indices = @transform_5, window_bounds = array<i64: 1, 384>}, {transform_indices = @transform_6, window_bounds = array<i64: 1, 1, 384>}]} {
    %c0_i32 = arith.constant 0 : i32
    %0 = arith.cmpi eq, %arg1, %c0_i32 : i32
    %1 = arith.extui %0 : i1 to i32
    %c0_i32_0 = arith.constant 0 : i32
    %2 = arith.cmpi ne, %1, %c0_i32_0 : i32
    scf.if %2 {
      %cst_26 = arith.constant 0.000000e+00 : bf16
      %40 = vector.broadcast %cst_26 : bf16 to vector<64x640xbf16>
      %c0_27 = arith.constant 0 : index
      %c0_28 = arith.constant 0 : index
      %41 = vector.load %arg9[%c0_27, %c0_28] : memref<64x640xbf16, #tpu.memory_space<vmem>>, vector<64x640xbf16>
      tpu.vector_store %arg9[%c0_27, %c0_28], %40 {strides = array<i32>} : memref<64x640xbf16, #tpu.memory_space<vmem>>, vector<64x640xbf16>,
      %c0_29 = arith.constant 0 : index
      %c0_30 = arith.constant 0 : index
      %c0_31 = arith.constant 0 : index
      %42 = vector.load %arg2[%c0_29, %c0_30, %c0_31] : memref<1x1x384xf32, #tpu.memory_space<vmem>>, vector<1x1x384xf32>
      %43 = vector.shape_cast %42 : vector<1x1x384xf32> to vector<1x384xf32>
      %44 = arith.truncf %43 : vector<1x384xf32> to vector<1x384xbf16>
      %c0_32 = arith.constant 0 : index
      %c128_33 = arith.constant 128 : index
      %45 = vector.load %arg9[%c0_32, %c128_33] : memref<64x640xbf16, #tpu.memory_space<vmem>>, vector<1x384xbf16>
      tpu.vector_store %arg9[%c0_32, %c128_33], %44 {strides = array<i32>} : memref<64x640xbf16, #tpu.memory_space<vmem>>, vector<1x384xbf16>,
      %cst_34 = arith.constant 0.000000e+00 : bf16
      %46 = vector.broadcast %cst_34 : bf16 to vector<64x384xbf16>
      %c576 = arith.constant 576 : index
      %c0_35 = arith.constant 0 : index
      %47 = vector.load %arg10[%c576, %c0_35] : memref<640x384xbf16, #tpu.memory_space<vmem>>, vector<64x384xbf16>
      tpu.vector_store %arg10[%c576, %c0_35], %46 {strides = array<i32>} : memref<640x384xbf16, #tpu.memory_space<vmem>>, vector<64x384xbf16>,
    } else {
    }
    %c0 = arith.constant 0 : index
    %c0_1 = arith.constant 0 : index
    %3 = vector.load %arg9[%c0, %c0_1] : memref<64x640xbf16, #tpu.memory_space<vmem>>, vector<64x640xbf16>
    %4 = vector.extract_strided_slice %3 {offsets = [0, 109], sizes = [64, 384], strides = [1, 1]} : vector<64x640xbf16> to vector<64x384xbf16>
    %c0_2 = arith.constant 0 : index
    %c0_3 = arith.constant 0 : index
    %5 = vector.load %arg10[%c0_2, %c0_3] : memref<640x384xbf16, #tpu.memory_space<vmem>>, vector<64x384xbf16>
    tpu.vector_store %arg10[%c0_2, %c0_3], %4 {strides = array<i32>} : memref<640x384xbf16, #tpu.memory_space<vmem>>, vector<64x384xbf16>,
    %6 = vector.extract_strided_slice %3 {offsets = [0, 110], sizes = [64, 384], strides = [1, 1]} : vector<64x640xbf16> to vector<64x384xbf16>
    %c64 = arith.constant 64 : index
    %c0_4 = arith.constant 0 : index
    %7 = vector.load %arg10[%c64, %c0_4] : memref<640x384xbf16, #tpu.memory_space<vmem>>, vector<64x384xbf16>
    tpu.vector_store %arg10[%c64, %c0_4], %6 {strides = array<i32>} : memref<640x384xbf16, #tpu.memory_space<vmem>>, vector<64x384xbf16>,
    %8 = vector.extract_strided_slice %3 {offsets = [0, 111], sizes = [64, 384], strides = [1, 1]} : vector<64x640xbf16> to vector<64x384xbf16>
    %c128 = arith.constant 128 : index
    %c0_5 = arith.constant 0 : index
    %9 = vector.load %arg10[%c128, %c0_5] : memref<640x384xbf16, #tpu.memory_space<vmem>>, vector<64x384xbf16>
    tpu.vector_store %arg10[%c128, %c0_5], %8 {strides = array<i32>} : memref<640x384xbf16, #tpu.memory_space<vmem>>, vector<64x384xbf16>,
    %10 = vector.extract_strided_slice %3 {offsets = [0, 127], sizes = [64, 384], strides = [1, 1]} : vector<64x640xbf16> to vector<64x384xbf16>
    %c192 = arith.constant 192 : index
    %c0_6 = arith.constant 0 : index
    %11 = vector.load %arg10[%c192, %c0_6] : memref<640x384xbf16, #tpu.memory_space<vmem>>, vector<64x384xbf16>
    tpu.vector_store %arg10[%c192, %c0_6], %10 {strides = array<i32>} : memref<640x384xbf16, #tpu.memory_space<vmem>>, vector<64x384xbf16>,
    %12 = vector.extract_strided_slice %3 {offsets = [0, 128], sizes = [64, 384], strides = [1, 1]} : vector<64x640xbf16> to vector<64x384xbf16>
    %c256 = arith.constant 256 : index
    %c0_7 = arith.constant 0 : index
    %13 = vector.load %arg10[%c256, %c0_7] : memref<640x384xbf16, #tpu.memory_space<vmem>>, vector<64x384xbf16>
    tpu.vector_store %arg10[%c256, %c0_7], %12 {strides = array<i32>} : memref<640x384xbf16, #tpu.memory_space<vmem>>, vector<64x384xbf16>,
    %14 = vector.extract_strided_slice %3 {offsets = [0, 129], sizes = [64, 384], strides = [1, 1]} : vector<64x640xbf16> to vector<64x384xbf16>
    %c320 = arith.constant 320 : index
    %c0_8 = arith.constant 0 : index
    %15 = vector.load %arg10[%c320, %c0_8] : memref<640x384xbf16, #tpu.memory_space<vmem>>, vector<64x384xbf16>
    tpu.vector_store %arg10[%c320, %c0_8], %14 {strides = array<i32>} : memref<640x384xbf16, #tpu.memory_space<vmem>>, vector<64x384xbf16>,
    %16 = vector.extract_strided_slice %3 {offsets = [0, 145], sizes = [64, 384], strides = [1, 1]} : vector<64x640xbf16> to vector<64x384xbf16>
    %c384 = arith.constant 384 : index
    %c0_9 = arith.constant 0 : index
    %17 = vector.load %arg10[%c384, %c0_9] : memref<640x384xbf16, #tpu.memory_space<vmem>>, vector<64x384xbf16>
    tpu.vector_store %arg10[%c384, %c0_9], %16 {strides = array<i32>} : memref<640x384xbf16, #tpu.memory_space<vmem>>, vector<64x384xbf16>,
    %18 = vector.extract_strided_slice %3 {offsets = [0, 146], sizes = [64, 384], strides = [1, 1]} : vector<64x640xbf16> to vector<64x384xbf16>
    %c448 = arith.constant 448 : index
    %c0_10 = arith.constant 0 : index
    %19 = vector.load %arg10[%c448, %c0_10] : memref<640x384xbf16, #tpu.memory_space<vmem>>, vector<64x384xbf16>
    tpu.vector_store %arg10[%c448, %c0_10], %18 {strides = array<i32>} : memref<640x384xbf16, #tpu.memory_space<vmem>>, vector<64x384xbf16>,
    %20 = vector.extract_strided_slice %3 {offsets = [0, 147], sizes = [64, 384], strides = [1, 1]} : vector<64x640xbf16> to vector<64x384xbf16>
    %c512 = arith.constant 512 : index
    %c0_11 = arith.constant 0 : index
    %21 = vector.load %arg10[%c512, %c0_11] : memref<640x384xbf16, #tpu.memory_space<vmem>>, vector<64x384xbf16>
    tpu.vector_store %arg10[%c512, %c0_11], %20 {strides = array<i32>} : memref<640x384xbf16, #tpu.memory_space<vmem>>, vector<64x384xbf16>,
    %c0_12 = arith.constant 0 : index
    %c0_13 = arith.constant 0 : index
    %c0_14 = arith.constant 0 : index
    %22 = vector.load %arg3[%c0_12, %c0_13, %c0_14] : memref<1x64x640xbf16, #tpu.memory_space<vmem>>, vector<1x64x640xbf16>
    %23 = vector.shape_cast %22 : vector<1x64x640xbf16> to vector<64x640xbf16>
    %c0_15 = arith.constant 0 : index
    %c0_16 = arith.constant 0 : index
    %24 = vector.load %arg10[%c0_15, %c0_16] : memref<640x384xbf16, #tpu.memory_space<vmem>>, vector<640x384xbf16>
    %cst = arith.constant dense<0.000000e+00> : vector<64x384xf32>
    %25 = tpu.matmul %23, %24, %cst {dimension_numbers = #tpu.dot_dimension_numbers<[1], [0], [0], [1], [0, 0, 1, 1], [], []>} : vector<64x640xbf16>, vector<640x384xbf16>, vector<64x384xf32> -> vector<64x384xf32>
    %c0_17 = arith.constant 0 : index
    %c0_18 = arith.constant 0 : index
    %c0_19 = arith.constant 0 : index
    %26 = vector.load %arg4[%c0_17, %c0_18, %c0_19] : memref<1x64x1xf32, #tpu.memory_space<vmem>>, vector<1x64x1xf32>
    %27 = vector.shape_cast %26 : vector<1x64x1xf32> to vector<64x1xf32>
    %28 = vector.broadcast %27 : vector<64x1xf32> to vector<64x384xf32>
    %29 = arith.addf %25, %28 : vector<64x384xf32>
    %cst_20 = arith.constant 0.000000e+00 : f32
    %30 = vector.broadcast %cst_20 : f32 to vector<64x384xf32>
    %31 = arith.maximumf %29, %30 : vector<64x384xf32>
    %c0_21 = arith.constant 0 : index
    %c0_22 = arith.constant 0 : index
    %32 = vector.load %arg7[%c0_21, %c0_22] : memref<1x384xf32, #tpu.memory_space<vmem>>, vector<1x384xf32>
    %33 = vector.broadcast %32 : vector<1x384xf32> to vector<64x384xf32>
    %34 = arith.mulf %31, %33 : vector<64x384xf32>
    %35 = arith.truncf %34 : vector<64x384xf32> to vector<64x384xbf16>
    %c0_23 = arith.constant 0 : index
    %c128_24 = arith.constant 128 : index
    %36 = vector.load %arg9[%c0_23, %c128_24] : memref<64x640xbf16, #tpu.memory_space<vmem>>, vector<64x384xbf16>
    tpu.vector_store %arg9[%c0_23, %c128_24], %35 {strides = array<i32>} : memref<64x640xbf16, #tpu.memory_space<vmem>>, vector<64x384xbf16>,
    %c18_i32 = arith.constant 18 : i32
    %37 = arith.cmpi eq, %arg1, %c18_i32 : i32
    %38 = arith.extui %37 : i1 to i32
    %c0_i32_25 = arith.constant 0 : i32
    %39 = arith.cmpi ne, %38, %c0_i32_25 : i32
    scf.if %39 {
      %c0_26 = arith.constant 0 : index
      %c0_27 = arith.constant 0 : index
      %40 = vector.load %arg9[%c0_26, %c0_27] : memref<64x640xbf16, #tpu.memory_space<vmem>>, vector<64x640xbf16>
      %41 = vector.extract_strided_slice %40 {offsets = [0, 109], sizes = [64, 384], strides = [1, 1]} : vector<64x640xbf16> to vector<64x384xbf16>
      %c0_28 = arith.constant 0 : index
      %c0_29 = arith.constant 0 : index
      %42 = vector.load %arg10[%c0_28, %c0_29] : memref<640x384xbf16, #tpu.memory_space<vmem>>, vector<64x384xbf16>
      tpu.vector_store %arg10[%c0_28, %c0_29], %41 {strides = array<i32>} : memref<640x384xbf16, #tpu.memory_space<vmem>>, vector<64x384xbf16>,
      %43 = vector.extract_strided_slice %40 {offsets = [0, 110], sizes = [64, 384], strides = [1, 1]} : vector<64x640xbf16> to vector<64x384xbf16>
      %c64_30 = arith.constant 64 : index
      %c0_31 = arith.constant 0 : index
      %44 = vector.load %arg10[%c64_30, %c0_31] : memref<640x384xbf16, #tpu.memory_space<vmem>>, vector<64x384xbf16>
      tpu.vector_store %arg10[%c64_30, %c0_31], %43 {strides = array<i32>} : memref<640x384xbf16, #tpu.memory_space<vmem>>, vector<64x384xbf16>,
      %45 = vector.extract_strided_slice %40 {offsets = [0, 111], sizes = [64, 384], strides = [1, 1]} : vector<64x640xbf16> to vector<64x384xbf16>
      %c128_32 = arith.constant 128 : index
      %c0_33 = arith.constant 0 : index
      %46 = vector.load %arg10[%c128_32, %c0_33] : memref<640x384xbf16, #tpu.memory_space<vmem>>, vector<64x384xbf16>
      tpu.vector_store %arg10[%c128_32, %c0_33], %45 {strides = array<i32>} : memref<640x384xbf16, #tpu.memory_space<vmem>>, vector<64x384xbf16>,
      %47 = vector.extract_strided_slice %40 {offsets = [0, 127], sizes = [64, 384], strides = [1, 1]} : vector<64x640xbf16> to vector<64x384xbf16>
      %c192_34 = arith.constant 192 : index
      %c0_35 = arith.constant 0 : index
      %48 = vector.load %arg10[%c192_34, %c0_35] : memref<640x384xbf16, #tpu.memory_space<vmem>>, vector<64x384xbf16>
      tpu.vector_store %arg10[%c192_34, %c0_35], %47 {strides = array<i32>} : memref<640x384xbf16, #tpu.memory_space<vmem>>, vector<64x384xbf16>,
      %49 = vector.extract_strided_slice %40 {offsets = [0, 128], sizes = [64, 384], strides = [1, 1]} : vector<64x640xbf16> to vector<64x384xbf16>
      %c256_36 = arith.constant 256 : index
      %c0_37 = arith.constant 0 : index
      %50 = vector.load %arg10[%c256_36, %c0_37] : memref<640x384xbf16, #tpu.memory_space<vmem>>, vector<64x384xbf16>
      tpu.vector_store %arg10[%c256_36, %c0_37], %49 {strides = array<i32>} : memref<640x384xbf16, #tpu.memory_space<vmem>>, vector<64x384xbf16>,
      %51 = vector.extract_strided_slice %40 {offsets = [0, 129], sizes = [64, 384], strides = [1, 1]} : vector<64x640xbf16> to vector<64x384xbf16>
      %c320_38 = arith.constant 320 : index
      %c0_39 = arith.constant 0 : index
      %52 = vector.load %arg10[%c320_38, %c0_39] : memref<640x384xbf16, #tpu.memory_space<vmem>>, vector<64x384xbf16>
      tpu.vector_store %arg10[%c320_38, %c0_39], %51 {strides = array<i32>} : memref<640x384xbf16, #tpu.memory_space<vmem>>, vector<64x384xbf16>,
      %53 = vector.extract_strided_slice %40 {offsets = [0, 145], sizes = [64, 384], strides = [1, 1]} : vector<64x640xbf16> to vector<64x384xbf16>
      %c384_40 = arith.constant 384 : index
      %c0_41 = arith.constant 0 : index
      %54 = vector.load %arg10[%c384_40, %c0_41] : memref<640x384xbf16, #tpu.memory_space<vmem>>, vector<64x384xbf16>
      tpu.vector_store %arg10[%c384_40, %c0_41], %53 {strides = array<i32>} : memref<640x384xbf16, #tpu.memory_space<vmem>>, vector<64x384xbf16>,
      %55 = vector.extract_strided_slice %40 {offsets = [0, 146], sizes = [64, 384], strides = [1, 1]} : vector<64x640xbf16> to vector<64x384xbf16>
      %c448_42 = arith.constant 448 : index
      %c0_43 = arith.constant 0 : index
      %56 = vector.load %arg10[%c448_42, %c0_43] : memref<640x384xbf16, #tpu.memory_space<vmem>>, vector<64x384xbf16>
      tpu.vector_store %arg10[%c448_42, %c0_43], %55 {strides = array<i32>} : memref<640x384xbf16, #tpu.memory_space<vmem>>, vector<64x384xbf16>,
      %57 = vector.extract_strided_slice %40 {offsets = [0, 147], sizes = [64, 384], strides = [1, 1]} : vector<64x640xbf16> to vector<64x384xbf16>
      %c512_44 = arith.constant 512 : index
      %c0_45 = arith.constant 0 : index
      %58 = vector.load %arg10[%c512_44, %c0_45] : memref<640x384xbf16, #tpu.memory_space<vmem>>, vector<64x384xbf16>
      tpu.vector_store %arg10[%c512_44, %c0_45], %57 {strides = array<i32>} : memref<640x384xbf16, #tpu.memory_space<vmem>>, vector<64x384xbf16>,
      %c0_46 = arith.constant 0 : index
      %c0_47 = arith.constant 0 : index
      %59 = vector.load %arg5[%c0_46, %c0_47] : memref<8x640xbf16, #tpu.memory_space<vmem>>, vector<8x640xbf16>
      %c0_48 = arith.constant 0 : index
      %c0_49 = arith.constant 0 : index
      %60 = vector.load %arg10[%c0_48, %c0_49] : memref<640x384xbf16, #tpu.memory_space<vmem>>, vector<640x384xbf16>
      %cst_50 = arith.constant dense<0.000000e+00> : vector<8x384xf32>
      %61 = tpu.matmul %59, %60, %cst_50 {dimension_numbers = #tpu.dot_dimension_numbers<[1], [0], [0], [1], [0, 0, 1, 1], [], []>} : vector<8x640xbf16>, vector<640x384xbf16>, vector<8x384xf32> -> vector<8x384xf32>
      %62 = vector.extract_strided_slice %61 {offsets = [0, 0], sizes = [1, 384], strides = [1, 1]} : vector<8x384xf32> to vector<1x384xf32>
      %c0_51 = arith.constant 0 : index
      %c0_52 = arith.constant 0 : index
      %63 = vector.load %arg6[%c0_51, %c0_52] : memref<1x1xf32, #tpu.memory_space<vmem>>, vector<1x1xf32>
      %64 = vector.broadcast %63 : vector<1x1xf32> to vector<1x384xf32>
      %65 = arith.addf %62, %64 : vector<1x384xf32>
      %c0_53 = arith.constant 0 : index
      %c0_54 = arith.constant 0 : index
      %c0_55 = arith.constant 0 : index
      %66 = vector.load %arg2[%c0_53, %c0_54, %c0_55] : memref<1x1x384xf32, #tpu.memory_space<vmem>>, vector<1x1x384xf32>
      %67 = vector.shape_cast %66 : vector<1x1x384xf32> to vector<1x384xf32>
      %68 = arith.addf %65, %67 : vector<1x384xf32>
      %c0_56 = arith.constant 0 : index
      %c0_57 = arith.constant 0 : index
      %c0_58 = arith.constant 0 : index
      %69 = vector.load %arg8[%c0_56, %c0_57, %c0_58] : memref<1x1x384xf32, #tpu.memory_space<vmem>>, vector<1x1x384xf32>
      %70 = vector.shape_cast %69 : vector<1x1x384xf32> to vector<1x384xf32>
      %71 = vector.shape_cast %68 : vector<1x384xf32> to vector<1x1x384xf32>
      tpu.vector_store %arg8[%c0_56, %c0_57, %c0_58], %71 {strides = array<i32>} : memref<1x1x384xf32, #tpu.memory_space<vmem>>, vector<1x1x384xf32>,
    } else {
    }
    return
  }
  func.func @transform_0(%arg0: i32, %arg1: i32) -> (i32, i32, i32) {
    %c0_i32 = arith.constant 0 : i32
    %c0_i32_0 = arith.constant 0 : i32
    %c0_i32_1 = arith.constant 0 : i32
    return %arg0, %c0_i32, %c0_i32_0 : i32, i32, i32
  }
  func.func @transform_1(%arg0: i32, %arg1: i32) -> (i32, i32, i32) {
    %c0_i32 = arith.constant 0 : i32
    %c0_i32_0 = arith.constant 0 : i32
    %c0_i32_1 = arith.constant 0 : i32
    return %arg1, %c0_i32, %c0_i32_0 : i32, i32, i32
  }
  func.func @transform_2(%arg0: i32, %arg1: i32) -> (i32, i32, i32) {
    %c0_i32 = arith.constant 0 : i32
    %c0_i32_0 = arith.constant 0 : i32
    %c0_i32_1 = arith.constant 0 : i32
    return %arg1, %c0_i32, %c0_i32_0 : i32, i32, i32
  }
  func.func @transform_3(%arg0: i32, %arg1: i32) -> (i32, i32) {
    %c0_i32 = arith.constant 0 : i32
    %c0_i32_0 = arith.constant 0 : i32
    %c0_i32_1 = arith.constant 0 : i32
    return %c0_i32, %c0_i32_0 : i32, i32
  }
  func.func @transform_4(%arg0: i32, %arg1: i32) -> (i32, i32) {
    %c0_i32 = arith.constant 0 : i32
    %c0_i32_0 = arith.constant 0 : i32
    %c0_i32_1 = arith.constant 0 : i32
    return %c0_i32, %c0_i32_0 : i32, i32
  }
  func.func @transform_5(%arg0: i32, %arg1: i32) -> (i32, i32) {
    %c0_i32 = arith.constant 0 : i32
    %c0_i32_0 = arith.constant 0 : i32
    %c0_i32_1 = arith.constant 0 : i32
    return %c0_i32, %c0_i32_0 : i32, i32
  }
  func.func @transform_6(%arg0: i32, %arg1: i32) -> (i32, i32, i32) {
    %c0_i32 = arith.constant 0 : i32
    %c0_i32_0 = arith.constant 0 : i32
    %c0_i32_1 = arith.constant 0 : i32
    return %arg0, %c0_i32, %c0_i32_0 : i32, i32, i32
  }
}

</mosaic_0001>

<bundles_post_ra>
// kernel: squeeze.5
= control target key start
LH: loop header
LB: loop body
LE: loop exit
PB: predicated region body
PF: predicated region fallthrough
CT: control target
= control target key end

     0   :  { %s127_s12 = smov 3  ;;  %s19_s13 = smov 3  ;;  %vm16_vm0 = vcmask 146432   ;;  %vm132_vm1 = vcmask 1014784   ;;  %vm145_vm2 = vcmask 1031168   ;;  %vm136_vm3 = vcmask 31744   ;;  %s306_s0 = inlined_call_operand.vmem [shape: f32[2,324], index: 0, kind: input, shape index: {}]   ;;  %s307_s1 = inlined_call_operand.vmem [shape: f32[2,18,18], index: 1, kind: output, shape index: {}]  }
   0x1   :  { %v13_v0 = vld [vmem:[%s306_s0] sm:$0x3]  ;;  %v156_v1 = vld [vmem:[%s306_s0 + $0x4] sm:$0x3]  ;;  %v157_v2 = vld [vmem:[%s306_s0 + $0x2] sm:$0x3] }
   0x2   :  { %14 = vst [vmem:[#allocation0] sm:$0x3] %v13_v0  ;;  %8 = vst [vmem:[#allocation0 + $0x10] sm:$0x3] %v156_v1  ;;  %s130_s0 = smov 3  ;;  %s27_s14 = smov 3 }
   0x3   :  { %12 = vst [vmem:[#allocation0 + $0x8] sm:$0x3] %v157_v2  ;;  %s194_s15 = smov 110   ;;  %s195_s18 = smov 114   ;;  %vm139_vm4 = vcmask 146464   ;;  %vm149_vm5 = vcmask 15360  }
   0x4   :  { %s41_s19 = smov 3  ;;  %s196_s20 = smov 4   ;;  %vm152_vm6 = vcmask 146448  }
   0x5   :  { %s197_s21 = smov 112   ;;  %s49_s22 = smov 3 }
   0x6   :  { %s198_s23 = smov 2   ;;  %s199_s24 = smov 96  }
   0x7   :  { %s63_s25 = smov 3  ;;  %s71_s26 = smov 3 }
   0x8   :  { %s200_s27 = smov 94   ;;  %s201_s28 = smov 92  }
   0x9   :  { %v34_v3 = vld [vmem:[#allocation0] sm:$0x3]   ;;  %v131_v5 = vld [vmem:[#allocation0 + $0x11] ss:$-1 sm:%s130_s0]   ;;  %s85_s29 = smov 3  ;;  %s202_s30 = smov 78  }
   0xa   :  { %v15_v4 = vld [vmem:[#allocation0] sm:$0x3]   ;;  %35 = vrot.lane.b32.xlu0 %v34_v3, %s194_s15  ;;  %v128_v6 = vld [vmem:[#allocation0 + $0x9] ss:$-1 sm:%s127_s12]   ;;  %v20_v7 = vld [vmem:[#allocation0 + $0x11] ss:$-1 sm:%s19_s13]  }
   0xb   :  { %17 = vst.msk [vmem:[%s307_s1] ss:$24 sm:$0x3] %vm16_vm0, %v15_v4   ;;  %v133_v8 = vsel %vm132_vm1, %v131_v5, %v128_v6  ;;  %21 = vrot.lane.b32.xlu1 %v20_v7, %s195_s18  ;;  %v142_v9 = vld [vmem:[#allocation0] sm:$0x3]   ;;  %s203_s2 = smov 76  }
   0xc   :  { %v144_v10 = vld [vmem:[#allocation0 + $0x8] sm:$0x3]   ;;  %v42_v13 = vld [vmem:[#allocation0 + $0x11] ss:$-1 sm:%s41_s19]   ;;  %v56_v15 = vld [vmem:[#allocation0] sm:$0x3]  }
   0xd   :  { %v28_v11 = vld [vmem:[#allocation0 + $0x9] ss:$-1 sm:%s27_s14]   ;;  %v146_v12 = vsel %vm145_vm2, %v144_v10, %v142_v9  ;;  %v64_v16 = vld [vmem:[#allocation0 + $0x11] ss:$-1 sm:%s63_s25]   ;;  %v78_v18 = vld [vmem:[#allocation0] sm:$0x3]  }
   0xe   :  { %134 = vrot.lane.b32.xlu0 %v133_v8, %s196_s20  ;;  %v50_v14 = vld [vmem:[#allocation0 + $0x9] ss:$-1 sm:%s49_s22]   ;;  %s99_s3 = smov 3  ;;  %s204_s4 = smov 74   ;;  %v92_v20 = vld [vmem:[#allocation0] sm:$0x3]  }
   0xf   :  { %29 = vrot.lane.b32.xlu1 %v28_v11, %s197_s21  ;;  %v72_v17 = vld [vmem:[#allocation0 + $0x9] ss:$-1 sm:%s71_s26]   ;;  %s205_s5 = smov 58   ;;  %s113_s6 = smov 3  ;;  %v106_v22 = vld [vmem:[#allocation0] sm:$0x3]  }
  0x10   :  { %v86_v19 = vld [vmem:[#allocation0 + $0x9] ss:$-1 sm:%s85_s29]   ;;  %s206_s7 = smov 56   ;;  %s207_s8 = smov 40   ;;  %v120_v24 = vld [vmem:[#allocation0] sm:$0x3]  }
  0x11   :  { %v100_v21 = vld [vmem:[#allocation0 + $0x9] ss:$-1 sm:%s99_s3]   ;;  %s208_s9 = smov 38   ;;  %s209_s10 = smov 22  }
  0x12   :  { %147 = vrot.lane.b32.xlu0 %v146_v12, %s198_s23  ;;  %v114_v23 = vld [vmem:[#allocation0 + $0x9] ss:$-1 sm:%s113_s6]   ;;  %s210_s11 = smov 20  }
  0x13   :  { %43 = vrot.lane.b32.xlu1 %v42_v13, %s199_s24 }
  0x16   :  { %51 = vrot.lane.b32.xlu0 %v50_v14, %s200_s27 }
  0x17   :  { %57 = vrot.lane.b32.xlu1 %v56_v15, %s201_s28 }
  0x1a   :  { %65 = vrot.lane.b32.xlu0 %v64_v16, %s202_s30 }
  0x1b   :  { %73 = vrot.lane.b32.xlu1 %v72_v17, %s203_s2 }
  0x1e   :  { %79 = vrot.lane.b32.xlu0 %v78_v18, %s204_s4 }
  0x1f   :  { %87 = vrot.lane.b32.xlu1 %v86_v19, %s205_s5 }
  0x22   :  { %93 = vrot.lane.b32.xlu0 %v92_v20, %s206_s7 }
  0x23   :  { %101 = vrot.lane.b32.xlu1 %v100_v21, %s207_s8 }
  0x26   :  { %107 = vrot.lane.b32.xlu0 %v106_v22, %s208_s9 }
  0x27   :  { %115 = vrot.lane.b32.xlu1 %v114_v23, %s209_s10 }
  0x2a   :  { %121 = vrot.lane.b32.xlu0 %v120_v24, %s210_s11 }
  0x7c   :  { %v36_v25 = vpop.permute.xlu0 %35  }
  0x7d   :  { %160 = vst.msk [vmem:[%s307_s1 + $0x1] ss:$24 sm:$0x3] %vm16_vm0, %v36_v25   ;;  %v22_v26 = vpop.permute.xlu1 %21  }
  0x7e   :  { %158 = vst.msk [vmem:[%s307_s1 + $0x27] ss:$-24 sm:$0x3] %vm16_vm0, %v22_v26  }
  0x80   :  { %v135_v27 = vpop.permute.xlu0 %134  }
  0x81   :  { %173 = vst.msk [vmem:[%s307_s1 + $0x26] ss:$-24 sm:$0x3] %vm136_vm3, %v135_v27   ;;  %v30_v28 = vpop.permute.xlu1 %29  }
  0x82   :  { %174 = vst.msk [vmem:[%s307_s1 + $0x26] ss:$-24 sm:$0x3] %vm139_vm4, %v135_v27  }
  0x83   :  { %159 = vst.msk [vmem:[%s307_s1 + $0x20] ss:$-24 sm:$0x3] %vm16_vm0, %v30_v28  }
  0x84   :  { %v148_v29 = vpop.permute.xlu0 %147  }
  0x85   :  { %175 = vst.msk [vmem:[%s307_s1 + $0x7] ss:$24 sm:$0x3] %vm149_vm5, %v148_v29   ;;  %v44_v30 = vpop.permute.xlu1 %43  }
  0x86   :  { %176 = vst.msk [vmem:[%s307_s1 + $0x7] ss:$24 sm:$0x3] %vm152_vm6, %v148_v29  }
  0x87   :  { %161 = vst.msk [vmem:[%s307_s1 + $0x28] ss:$-24 sm:$0x3] %vm16_vm0, %v44_v30  }
  0x88   :  { %v52_v31 = vpop.permute.xlu0 %51  }
  0x89   :  { %162 = vst.msk [vmem:[%s307_s1 + $0x21] ss:$-24 sm:$0x3] %vm16_vm0, %v52_v31   ;;  %v58_v32 = vpop.permute.xlu1 %57  }
  0x8a   :  { %163 = vst.msk [vmem:[%s307_s1 + $0x2] ss:$24 sm:$0x3] %vm16_vm0, %v58_v32  }
  0x8c   :  { %v66_v33 = vpop.permute.xlu0 %65  }
  0x8d   :  { %164 = vst.msk [vmem:[%s307_s1 + $0x29] ss:$-24 sm:$0x3] %vm16_vm0, %v66_v33   ;;  %v74_v34 = vpop.permute.xlu1 %73  }
  0x8e   :  { %165 = vst.msk [vmem:[%s307_s1 + $0x22] ss:$-24 sm:$0x3] %vm16_vm0, %v74_v34  }
  0x90   :  { %v80_v35 = vpop.permute.xlu0 %79  }
  0x91   :  { %166 = vst.msk [vmem:[%s307_s1 + $0x3] ss:$24 sm:$0x3] %vm16_vm0, %v80_v35   ;;  %v88_v36 = vpop.permute.xlu1 %87  }
  0x92   :  { %167 = vst.msk [vmem:[%s307_s1 + $0x23] ss:$-24 sm:$0x3] %vm16_vm0, %v88_v36  }
  0x94   :  { %v94_v37 = vpop.permute.xlu0 %93  }
  0x95   :  { %168 = vst.msk [vmem:[%s307_s1 + $0x4] ss:$24 sm:$0x3] %vm16_vm0, %v94_v37   ;;  %v102_v38 = vpop.permute.xlu1 %101  }
  0x96   :  { %169 = vst.msk [vmem:[%s307_s1 + $0x24] ss:$-24 sm:$0x3] %vm16_vm0, %v102_v38  }
  0x98   :  { %v108_v39 = vpop.permute.xlu0 %107  }
  0x99   :  { %170 = vst.msk [vmem:[%s307_s1 + $0x5] ss:$24 sm:$0x3] %vm16_vm0, %v108_v39   ;;  %v116_v40 = vpop.permute.xlu1 %115  }
  0x9a   :  { %171 = vst.msk [vmem:[%s307_s1 + $0x25] ss:$-24 sm:$0x3] %vm16_vm0, %v116_v40  }
  0x9c   :  { %v122_v41 = vpop.permute.xlu0 %121  }
  0x9d   :  { %172 = vst.msk [vmem:[%s307_s1 + $0x6] ss:$24 sm:$0x3] %vm16_vm0, %v122_v41  }

// kernel: vdsr_forward.1
= control target key start
LH: loop header
LB: loop body
LE: loop exit
PB: predicated region body
PF: predicated region fallthrough
CT: control target
= control target key end

     0   :  { %s3385_s23 = smov 0   ;;  %s3387_s24 = smov 0   ;;  %s4720_s0 = inlined_call_operand.vmem [shape: f32[2,1,384], index: 0, kind: input, shape index: {}]   ;;  %s4721_s1 = inlined_call_operand.vmem [shape: bf16[19,64,640], index: 1, kind: input, shape index: {}]   ;;  %s4722_s2 = inlined_call_operand.vmem [shape: f32[19,64,1], index: 2, kind: input, shape index: {}]   ;;  %s4723_s3 = inlined_call_operand.vmem [shape: bf16[8,640], index: 3, kind: input, shape index: {}]   ;;  %s4724_s4 = inlined_call_operand.<no memory space> [shape: f32[1,1], index: 4, kind: input, shape index: {}]   ;;  %s4725_s5 = inlined_call_operand.vmem [shape: f32[1,384], index: 5, kind: input, shape index: {}]   ;;  %s4726_s6 = inlined_call_operand.vmem [shape: f32[2,1,384], index: 6, kind: output, shape index: {}]  }
   0x1   :  { %v11_v0 = vstv %s4724_s4  ;;  %s3389_s25 = smov 0   ;;  %s3391_s26 = smov 0  }
   0x2   :  { %12 = vst [vmem:[#allocation4] sm:$0x1] %v11_v0  ;;  %s3393_s27 = smov 0  }
   0x3 LB: > { %s27_s4 = sadd.s32 1, %s3315_s25  ;;  %s30_s28 = sadd.s32 1, %s3319_s26  ;;  %s3323_s27 = sphi %s3393_s27, %s18_s27   ;;  %s3319_s26 = sphi %s3391_s26, %s4730_s26   ;;  %s3315_s25 = sphi %s3389_s25, %s4729_s25   ;;  %s3311_s24 = sphi %s3387_s24, %s4728_s24   ;;  %s3307_s23 = sphi %s3385_s23, %s4727_s23  }
   0x4   : > { %p28_p0 = scmp.ge.s32.totalorder %s27_s4, 19  ;;  %p2914_p1 = scmp.ge.s32.totalorder %s3323_s27, 1 }
   0x5   : > { %p245_p2 = scmp.lt.s32.totalorder %s3323_s27, 39 }
   0x6   : > { %s4732_s4 = smov (%p28_p0, %s27_s4), 0  ;;  %s4734_s28 = smov (!%p28_p0, %s30_s28), %s3319_s26 }
   0x7   : > { %p246_p3 = pnand %p2914_p1, %p245_p2  ;;  %p32_p4 = scmp.ge.s32.totalorder %s4734_s28, 2 }
   0x8   : > { %p283_p5 = scmp.lt.s32.totalorder (!%p246_p3), %s3311_s24, 1  ;;  %p287_p6 = scmp.lt.s32.totalorder (!%p246_p3), %s3307_s23, 18 }
   0x9   : > { %s4736_s28 = smov (%p32_p4, %s4734_s28), 0  ;;  %249 = sbr.rel (%p246_p3) target bundleno = 1263 (0x4ef), region = 44 }
   0xa   : > { %p2918_p7 = scmp.ne.s32.totalorder (!%p246_p3), %s3307_s23, 0 }
  0x10   : > { %s4738_s24 = smov (!%p283_p5, %s3311_s24), 1  ;;  %305 = sbr.rel (%p2918_p7) target bundleno = 39 (0x27), region = 48 }
  0x11   : > { %s288_s29 = scalar_select %p287_p6, %s3307_s23, 18 }
  0x12   : > { %s3185_s30 = smul.u32 3, %s4738_s24  ;;  %v328_v1 = vlaneseq (!%p2918_p7)  ;;  %v3325_v2 = vmov (!%p2918_p7), 0   ;;  %vm346_vm0 = vcmask (!%p2918_p7), 1040384   ;;  %vm347_vm1 = vsmask.f32 (!%p2918_p7), 256 }
  0x13   : > { %s3186_s7 = smul.u32 160, %s288_s29  ;;  %s2947_s8 = sshll.u32 %s288_s29, 6  ;;  %307 = vst [vmem:[#allocation2 + $0x8] sm:$0xff] (!%p2918_p7), %v3325_v2  ;;  %306 = vst [vmem:[#allocation2] sm:$0xff] (!%p2918_p7), %v3325_v2 }
  0x14   : > { %s3422_s11 = scalar_lea.vmem %s4720_s0, %s3185_s30  ;;  %s3427_s14 = scalar_lea.vmem %s4722_s2, %s2947_s8  ;;  %308 = vst [vmem:[#allocation2 + $0x10] sm:$0xff] (!%p2918_p7), %v3325_v2  ;;  %309 = vst [vmem:[#allocation2 + $0x18] sm:$0xff] (!%p2918_p7), %v3325_v2  ;;  %v329_v3 = vshrl.u32 (!%p2918_p7), %v328_v1, 7 }
  0x15   : > { %s3432_s17 = scalar_lea.vmem %s4721_s1, %s3186_s7  ;;  %s3437_s20 = scalar_lea.vmem %s4726_s6, %s3185_s30  ;;  %310 = vst [vmem:[#allocation2 + $0x20] sm:$0xff] (!%p2918_p7), %v3325_v2  ;;  %311 = vst [vmem:[#allocation2 + $0x28] sm:$0xff] (!%p2918_p7), %v3325_v2  ;;  %v326_v4 = vld [vmem:[%s3422_s11] sm:$0x7] (!%p2918_p7) }
  0x16   : > { %312 = vst [vmem:[#allocation2 + $0x30] sm:$0xff] (!%p2918_p7), %v3325_v2  ;;  %313 = vst [vmem:[#allocation2 + $0x38] sm:$0xff] (!%p2918_p7), %v3325_v2  ;;  %v330_v5 = vsub.s32 (!%p2918_p7), 0, %v329_v3  ;;  %v334_v6 = vsub.s32 (!%p2918_p7), 1, %v329_v3  ;;  %v338_v7 = vsub.s32 (!%p2918_p7), 2, %v329_v3 }
  0x17   : > { %314 = vst [vmem:[#allocation2 + $0x40] sm:$0xff] %v3325_v2  ;;  %315 = vst [vmem:[#allocation2 + $0x48] sm:$0xff] %v3325_v2 }
  0x18   : > { %316 = vst [vmem:[#allocation2 + $0x50] sm:$0xff] %v3325_v2  ;;  %317 = vst [vmem:[#allocation2 + $0x58] sm:$0xff] %v3325_v2  ;;  %v331_v8 = vrot.slane %v326_v4, %v330_v5  ;;  %v335_v9 = vrot.slane %v326_v4, %v334_v6  ;;  %v339_v10 = vrot.slane %v326_v4, %v338_v7 }
  0x19   : > { %318 = vst [vmem:[#allocation2 + $0x60] sm:$0xff] %v3325_v2  ;;  %319 = vst [vmem:[#allocation2 + $0x68] sm:$0xff] %v3325_v2 }
  0x1a   : > { %320 = vst [vmem:[#allocation2 + $0x70] sm:$0xff] %v3325_v2  ;;  %321 = vst [vmem:[#allocation2 + $0x78] sm:$0xff] %v3325_v2  ;;  %v343_v11 = vpack.c.bf16 %v331_v8, %v331_v8  ;;  %v349_v12 = vld [vmem:[#allocation2 + $0x8] sm:$0x1]  ;;  %v344_v13 = vpack.c.bf16 %v335_v9, %v335_v9  ;;  %v345_v15 = vpack.c.bf16 %v339_v10, %v339_v10 }
  0x1b   : > { %322 = vst [vmem:[#allocation2 + $0x80] sm:$0xff] %v3325_v2  ;;  %323 = vst [vmem:[#allocation2 + $0x88] sm:$0xff] %v3325_v2  ;;  %v352_v14 = vld [vmem:[#allocation2 + $0x10] sm:$0x1]  ;;  %v355_v16 = vld [vmem:[#allocation2 + $0x18] sm:$0x1] }
  0x1c   : > { %324 = vst [vmem:[#allocation2 + $0x90] sm:$0xff] %v3325_v2  ;;  %325 = vst [vmem:[#allocation2 + $0x98] sm:$0xff] %v3325_v2 }
  0x1d   : > { %358 = vst [vmem:[#allocation3 + $0x360] sm:$0xff] %v3325_v2  ;;  %359 = vst [vmem:[#allocation3 + $0x368] sm:$0xff] %v3325_v2 }
  0x1e   : > { %360 = vst [vmem:[#allocation3 + $0x370] sm:$0xff] %v3325_v2  ;;  %361 = vst [vmem:[#allocation3 + $0x378] sm:$0xff] %v3325_v2 }
  0x1f   : > { %362 = vst [vmem:[#allocation3 + $0x380] sm:$0xff] %v3325_v2  ;;  %363 = vst [vmem:[#allocation3 + $0x388] sm:$0xff] %v3325_v2 }
  0x20   : > { %364 = vst [vmem:[#allocation3 + $0x390] sm:$0xff] %v3325_v2  ;;  %365 = vst [vmem:[#allocation3 + $0x398] sm:$0xff] %v3325_v2 }
  0x21   : > { %366 = vst [vmem:[#allocation3 + $0x3a0] sm:$0xff] %v3325_v2  ;;  %367 = vst [vmem:[#allocation3 + $0x3a8] sm:$0xff] %v3325_v2 }
  0x22   : > { %368 = vst [vmem:[#allocation3 + $0x3b0] sm:$0xff] %v3325_v2  ;;  %369 = vst [vmem:[#allocation3 + $0x3b8] sm:$0xff] %v3325_v2 }
  0x23   : > { %vm348_vm2 = vmand %vm346_vm0, %vm347_vm1 }
  0x24   : > { %v350_v17 = vsel %vm348_vm2, %v343_v11, %v349_v12  ;;  %v353_v18 = vsel %vm348_vm2, %v344_v13, %v352_v14  ;;  %v356_v19 = vsel %vm348_vm2, %v345_v15, %v355_v16 }
  0x25   : > { %351 = vst [vmem:[#allocation2 + $0x8] sm:$0x1] %v350_v17  ;;  %354 = vst [vmem:[#allocation2 + $0x10] sm:$0x1] %v353_v18 }
  0x26   : > { %357 = vst [vmem:[#allocation2 + $0x18] sm:$0x1] %v356_v19 }
  0x27 PF: > { %s3326_s21 = smov 19   ;;  %v3455_v25 = vld [vmem:[#allocation2 + $0x58] sm:$0xff]  ;;  %v3457_v26 = vld [vmem:[#allocation2 + $0x60] sm:$0xff]  ;;  %v3461_v28 = vld [vmem:[#allocation2 + $0x88] sm:$0xff]  ;;  %s3327_s22 = smov 18   ;;  %v3330_v36 = vmov 0  }
  0x28   : > { %v3459_v27 = vld [vmem:[#allocation2 + $0x80] sm:$0xff]  ;;  %v3469_v32 = vld [vmem:[#allocation2 + $0x68] sm:$0xff]  ;;  %v3478_v33 = vld [vmem:[#allocation2 + $0x90] sm:$0xff]  ;;  %s3328_s24 = smov 109   ;;  %s3329_s29 = smov 17   ;;  %1448 = vmatprep.mubr.bf16.mxu1 %v3330_v36  ;;  %3250 = vset.pattern.permute.xlu1 %v3330_v36  ;;  %vm438_vm3 = vcmask 154624  }
  0x29   : > { %690 = vst [vmem:[#allocation3 + $0x1c0] sm:$0xff] %v3469_v32  ;;  %693 = vst [vmem:[#allocation3 + $0x1d8] sm:$0xff] %v3478_v33  ;;  %v3489_v34 = vld [vmem:[#allocation2 + $0x50] sm:$0xff]  ;;  %v3495_v35 = vld [vmem:[#allocation2 + $0x78] sm:$0xff]  ;;  %3249 = vset.pattern.permute.xlu0 %v3330_v36  ;;  %s3331_s30 = smov 1   ;;  %vm507_vm4 = vcmask 146432  }
  0x2a   : > { %v3443_v21 = vld [vmem:[#allocation2] sm:$0xff]  ;;  %vm937_vm5 = vcmask 891904   ;;  %s3332_s7 = smov 127   ;;  %s3333_s8 = smov 111   ;;  %vm576_vm6 = vcmask 138240   ;;  %vm645_vm7 = vcmask 7168  }
  0x2b   : > { %406 = vrot.lane.b32.xlu1 %v3443_v21, %s3326_s21  ;;  %v3619_v47 = vld [vmem:[%s3432_s17 + $0x4] ss:$20 sps:$4 sm:$0xff]   ;;  %s3334_s9 = smov 110   ;;  %vm730_vm8 = vcmask 1039360   ;;  %vm799_vm9 = vcmask 908288   ;;  %vm868_vm10 = vcmask 900096  }
  0x2c   : > { %v3441_v20 = vld [vmem:[#allocation2 + $0x8] sm:$0xff]  ;;  %v3445_v22 = vld [vmem:[#allocation2 + $0x10] sm:$0xff]  ;;  %1302 = vmatprep.mubr.bf16.mxu0 %v3619_v47  ;;  %v3679_v10 = vld [vmem:[#allocation2 + $0x20] sm:$0xff]  ;;  %p2939_p8 = scmp.ne.s32.totalorder %s3307_s23, 18 }
  0x2d   : > { %408 = vrot.lane.b32.xlu0 %v3441_v20, %s3326_s21  ;;  %v3451_v23 = vld [vmem:[#allocation2 + $0x30] sm:$0xff]  ;;  %v3453_v24 = vld [vmem:[#allocation2 + $0x38] sm:$0xff]  ;;  %v3463_v29 = vld [vmem:[#allocation2 + $0x28] sm:$0xff]  ;;  %s3335_s13 = smov (!%p2939_p8), 19   ;;  %s3336_s23 = smov (!%p2939_p8), 18   ;;  %vm3345_vm11 = vmmov (!%p2939_p8), 0  }
  0x2e   : > { %v3465_v30 = vld [vmem:[#allocation2 + $0x18] sm:$0xff]  ;;  %v3467_v31 = vld [vmem:[#allocation2 + $0x40] sm:$0xff]  ;;  %v3698_v18 = vld [vmem:[#allocation2 + $0x48] sm:$0xff]  ;;  %s3338_s15 = smov (!%p2939_p8), 17   ;;  %s3339_s16 = smov (!%p2939_p8), 111  }
  0x2f   : > { %416 = vrot.lane.b32.xlu1 %v3451_v23, %s3326_s21  ;;  %684 = vst [vmem:[#allocation3 + $0x190] sm:$0xff] %v3465_v30  ;;  %687 = vst [vmem:[#allocation3 + $0x1a8] sm:$0xff] %v3467_v31  ;;  %s3341_s18 = smov (!%p2939_p8), 110  }
  0x31   : > { %410 = vrot.lane.b32.xlu0 %v3445_v22, %s3326_s21 }
  0x33   : > { %414 = vrot.lane.b32.xlu1 %v3463_v29, %s3326_s21 }
  0x35   : > { %418 = vrot.lane.b32.xlu0 %v3453_v24, %s3326_s21 }
  0x37   : > { %426 = vrot.lane.b32.xlu1 %v3457_v26, %s3326_s21 }
  0x39   : > { %424 = vrot.lane.b32.xlu0 %v3455_v25, %s3326_s21 }
  0x3b   : > { %432 = vrot.lane.b32.xlu1 %v3459_v27, %s3326_s21 }
  0x3d   : > { %422 = vrot.lane.b32.xlu0 %v3489_v34, %s3326_s21 }
  0x3f   : > { %430 = vrot.lane.b32.xlu1 %v3495_v35, %s3326_s21 }
  0x41   : > { %434 = vrot.lane.b32.xlu0 %v3461_v28, %s3326_s21 }
  0x43   : > { %479 = vrot.lane.b32.xlu1 %v3445_v22, %s3327_s22 }
  0x45   : > { %477 = vrot.lane.b32.xlu0 %v3441_v20, %s3327_s22 }
  0x47   : > { %907 = vrot.lane.b32.xlu1 %v3445_v22, %s3328_s24 }
  0x49   : > { %475 = vrot.lane.b32.xlu0 %v3443_v21, %s3327_s22 }
  0x4b   : > { %905 = vrot.lane.b32.xlu1 %v3441_v20, %s3328_s24 }
  0x4d   : > { %909 = vrot.lane.b32.xlu0 %v3465_v30, %s3328_s24 }
  0x4f   : > { %487 = vrot.lane.b32.xlu1 %v3453_v24, %s3327_s22 }
  0x51   : > { %485 = vrot.lane.b32.xlu0 %v3451_v23, %s3327_s22 }
  0x53   : > { %915 = vrot.lane.b32.xlu1 %v3453_v24, %s3328_s24 }
  0x55   : > { %483 = vrot.lane.b32.xlu0 %v3463_v29, %s3327_s22 }
  0x57   : > { %913 = vrot.lane.b32.xlu1 %v3451_v23, %s3328_s24 }
  0x59   : > { %917 = vrot.lane.b32.xlu0 %v3467_v31, %s3328_s24 }
  0x5b   : > { %495 = vrot.lane.b32.xlu1 %v3457_v26, %s3327_s22 }
  0x5d   : > { %493 = vrot.lane.b32.xlu0 %v3455_v25, %s3327_s22 }
  0x5f   : > { %923 = vrot.lane.b32.xlu1 %v3457_v26, %s3328_s24 }
  0x61   : > { %491 = vrot.lane.b32.xlu0 %v3489_v34, %s3327_s22 }
  0x63   : > { %921 = vrot.lane.b32.xlu1 %v3455_v25, %s3328_s24 }
  0x65   : > { %925 = vrot.lane.b32.xlu0 %v3469_v32, %s3328_s24 }
  0x67   : > { %503 = vrot.lane.b32.xlu1 %v3461_v28, %s3327_s22 }
  0x69   : > { %501 = vrot.lane.b32.xlu0 %v3459_v27, %s3327_s22 }
  0x6b   : > { %931 = vrot.lane.b32.xlu1 %v3461_v28, %s3328_s24 }
  0x6d   : > { %499 = vrot.lane.b32.xlu0 %v3495_v35, %s3327_s22 }
  0x6f   : > { %929 = vrot.lane.b32.xlu1 %v3459_v27, %s3328_s24 }
  0x71   : > { %933 = vrot.lane.b32.xlu0 %v3478_v33, %s3328_s24 }
  0x73   : > { %548 = vrot.lane.b32.xlu1 %v3445_v22, %s3329_s29 }
  0x75   : > { %546 = vrot.lane.b32.xlu0 %v3441_v20, %s3329_s29 }
  0x77   : > { %554 = vrot.lane.b32.xlu1 %v3451_v23, %s3329_s29 }
  0x79   : > { %544 = vrot.lane.b32.xlu0 %v3443_v21, %s3329_s29 }
  0x7b   : > { %552 = vrot.lane.b32.xlu1 %v3463_v29, %s3329_s29 }
  0x7d   : > { %556 = vrot.lane.b32.xlu0 %v3453_v24, %s3329_s29 }
  0x7f   : > { %564 = vrot.lane.b32.xlu1 %v3457_v26, %s3329_s29 }
  0x81   : > { %562 = vrot.lane.b32.xlu0 %v3455_v25, %s3329_s29 }
  0x83   : > { %570 = vrot.lane.b32.xlu1 %v3459_v27, %s3329_s29 }
  0x85   : > { %560 = vrot.lane.b32.xlu0 %v3489_v34, %s3329_s29 }
  0x87   : > { %568 = vrot.lane.b32.xlu1 %v3495_v35, %s3329_s29 }
  0x89   : > { %572 = vrot.lane.b32.xlu0 %v3461_v28, %s3329_s29 }
  0x8b   : > { %617 = vrot.lane.b32.xlu1 %v3445_v22, %s3331_s30 }
  0x8d   : > { %615 = vrot.lane.b32.xlu0 %v3441_v20, %s3331_s30 }
  0x8f   : > { %550 = vrot.lane.b32.xlu1 %v3465_v30, %s3329_s29 }
  0x91   : > { %613 = vrot.lane.b32.xlu0 %v3443_v21, %s3331_s30 }
  0x93   : > { %623 = vrot.lane.b32.xlu1 %v3451_v23, %s3331_s30 }
  0x95   : > { %412 = vrot.lane.b32.xlu0 %v3465_v30, %s3326_s21 }
  0x97   : > { %621 = vrot.lane.b32.xlu1 %v3463_v29, %s3331_s30 }
  0x99   : > { %625 = vrot.lane.b32.xlu0 %v3453_v24, %s3331_s30 }
  0x9b   : > { %420 = vrot.lane.b32.xlu1 %v3467_v31, %s3326_s21 }
  0x9d   : > { %558 = vrot.lane.b32.xlu0 %v3467_v31, %s3329_s29  ;;  %v407_v38 = vpop.permute.xlu1 %406 }
  0x9f   : > { %v409_v37 = vpop.permute.xlu0 %408  ;;  %633 = vrot.lane.b32.xlu1 %v3457_v26, %s3331_s30 }
  0xa0   : > { %v439_v39 = vsel %vm438_vm3, %v407_v38, %v409_v37 }
  0xa1   : > { %631 = vrot.lane.b32.xlu0 %v3455_v25, %s3331_s30  ;;  %v417_v41 = vpop.permute.xlu1 %416 }
  0xa3   : > { %v3601_v40 = vpop.permute.xlu0 %410  ;;  %566 = vrot.lane.b32.xlu1 %v3469_v32, %s3329_s29 }
  0xa4   : > { %v440_v42 = vsel %vm438_vm3, %v409_v37, %v3601_v40 }
  0xa5   : > { %629 = vrot.lane.b32.xlu0 %v3489_v34, %s3331_s30  ;;  %1270 = vmatprep.subr.bf16.mxu0 %v440_v42  ;;  %v415_v44 = vpop.permute.xlu1 %414 }
  0xa6   : > { %1271 = vmatpush1.bf16.msra.mxu0 %v439_v39  ;;  %v442_v46 = vsel %vm438_vm3, %v415_v44, %v417_v41  ;;  %v3722_v44 = vld [vmem:[#allocation2 + $0x70] sm:$0xff] }
  0xa7   : > { %v3609_v43 = vpop.permute.xlu0 %418  ;;  %639 = vrot.lane.b32.xlu1 %v3459_v27, %s3331_s30 }
  0xa8   : > { %v443_v45 = vsel %vm438_vm3, %v417_v41, %v3609_v43 }
  0xa9   : > { %428 = vrot.lane.b32.xlu0 %v3469_v32, %s3326_s21  ;;  %1272 = vmatprep.subr.bf16.mxu0 %v443_v45  ;;  %v3621_v49 = vpop.permute.xlu1 %426 }
  0xaa   : > { %1273 = vmatpush1.bf16.msra.mxu0 %v442_v46 }
  0xab   : > { %v425_v48 = vpop.permute.xlu0 %424  ;;  %637 = vrot.lane.b32.xlu1 %v3495_v35, %s3331_s30 }
  0xac   : > { %v446_v50 = vsel %vm438_vm3, %v425_v48, %v3621_v49 }
  0xad   : > { %641 = vrot.lane.b32.xlu0 %v3461_v28, %s3331_s30  ;;  %1274 = vmatprep.subr.bf16.mxu0 %v446_v50  ;;  %v433_v52 = vpop.permute.xlu1 %432 }
  0xaf   : > { %v423_v51 = vpop.permute.xlu0 %422  ;;  %436 = vrot.lane.b32.xlu1 %v3478_v33, %s3326_s21 }
  0xb0   : > { %v445_v53 = vsel %vm438_vm3, %v423_v51, %v425_v48 }
  0xb1   : > { %574 = vrot.lane.b32.xlu0 %v3478_v33, %s3329_s29  ;;  %1275 = vmatpush1.bf16.msra.mxu0 %v445_v53  ;;  %v431_v55 = vpop.permute.xlu1 %430 }
  0xb2   : > { %v448_v57 = vsel %vm438_vm3, %v431_v55, %v433_v52  ;;  %v1107_v55 = vld [vmem:[#allocation3 + $0x368] sm:$0xff] }
  0xb3   : > { %v3635_v54 = vpop.permute.xlu0 %434  ;;  %481 = vrot.lane.b32.xlu1 %v3465_v30, %s3327_s22 }
  0xb4   : > { %v449_v56 = vsel %vm438_vm3, %v433_v52, %v3635_v54 }
  0xb5   : > { %619 = vrot.lane.b32.xlu0 %v3465_v30, %s3331_s30  ;;  %1276 = vmatprep.subr.bf16.mxu0 %v449_v56  ;;  %v3644_v59 = vpop.permute.xlu1 %479  ;;  %v3738_v56 = vld [vmem:[#allocation2 + $0x98] sm:$0xff] }
  0xb6   : > { %1277 = vmatpush1.bf16.msra.mxu0 %v448_v57 }
  0xb7   : > { %v478_v58 = vpop.permute.xlu0 %477  ;;  %489 = vrot.lane.b32.xlu1 %v3467_v31, %s3327_s22 }
  0xb8   : > { %v509_v60 = vsel %vm507_vm4, %v478_v58, %v3644_v59 }
  0xb9   : > { %627 = vrot.lane.b32.xlu0 %v3467_v31, %s3331_s30  ;;  %1278 = vmatprep.subr.bf16.mxu0 %v509_v60  ;;  %v908_v62 = vpop.permute.xlu1 %907 }
  0xbb   : > { %v476_v61 = vpop.permute.xlu0 %475  ;;  %497 = vrot.lane.b32.xlu1 %v3469_v32, %s3327_s22 }
  0xbc   : > { %v508_v63 = vsel %vm507_vm4, %v476_v61, %v478_v58  ;;  %v1106_v61 = vld [vmem:[#allocation3 + $0x360] sm:$0xff] }
  0xbd   : > { %635 = vrot.lane.b32.xlu0 %v3469_v32, %s3331_s30  ;;  %1279 = vmatpush1.bf16.msra.mxu0 %v508_v63  ;;  %v906_v1 = vpop.permute.xlu1 %905 }
  0xbe   : > { %v938_v3 = vsel %vm937_vm5, %v906_v1, %v908_v62 }
  0xbf   : > { %v3657_v0 = vpop.permute.xlu0 %909  ;;  %505 = vrot.lane.b32.xlu1 %v3478_v33, %s3327_s22  ;;  %s3342_s22 = smov (!%p2939_p8), 109  }
  0xc0   : > { %v939_v2 = vsel %vm937_vm5, %v908_v62, %v3657_v0  ;;  %v1110_v62 = vld [vmem:[#allocation3 + $0x380] sm:$0xff] }
  0xc1   : > { %643 = vrot.lane.b32.xlu0 %v3478_v33, %s3331_s30  ;;  %1416 = vmatprep.subr.bf16.mxu1 %v939_v2  ;;  %v3666_v5 = vpop.permute.xlu1 %487 }
  0xc2   : > { %1417 = vmatpush1.bf16.msra.mxu1 %v938_v3  ;;  %v1109_v3 = vld [vmem:[#allocation3 + $0x378] sm:$0xff] }
  0xc3   : > { %v486_v4 = vpop.permute.xlu0 %485  ;;  %702 = vrot.lane.b32.xlu1 %v3465_v30, %s3332_s7 }
  0xc4   : > { %v512_v6 = vsel %vm507_vm4, %v486_v4, %v3666_v5 }
  0xc5   : > { %700 = vrot.lane.b32.xlu0 %v3445_v22, %s3332_s7  ;;  %1280 = vmatprep.subr.bf16.mxu0 %v512_v6  ;;  %v916_v8 = vpop.permute.xlu1 %915 }
  0xc7   : > { %v484_v7 = vpop.permute.xlu0 %483  ;;  %771 = vrot.lane.b32.xlu1 %v3465_v30, %s3333_s8 }
  0xc8   : > { %v511_v9 = vsel %vm507_vm4, %v484_v7, %v486_v4  ;;  %v1113_v4 = vld [vmem:[#allocation3 + $0x398] sm:$0xff] }
  0xc9   : > { %698 = vrot.lane.b32.xlu0 %v3441_v20, %s3332_s7  ;;  %1281 = vmatpush1.bf16.msra.mxu0 %v511_v9  ;;  %v914_v12 = vpop.permute.xlu1 %913 }
  0xca   : > { %v941_v14 = vsel %vm937_vm5, %v914_v12, %v916_v8  ;;  %v1112_v12 = vld [vmem:[#allocation3 + $0x390] sm:$0xff] }
  0xcb   : > { %v3681_v11 = vpop.permute.xlu0 %917  ;;  %708 = vrot.lane.b32.xlu1 %v3453_v24, %s3332_s7 }
  0xcc   : > { %v942_v13 = vsel %vm937_vm5, %v916_v8, %v3681_v11 }
  0xcd   : > { %773 = vrot.lane.b32.xlu0 %v3679_v10, %s3333_s8  ;;  %1418 = vmatprep.subr.bf16.mxu1 %v942_v13  ;;  %v3690_v16 = vpop.permute.xlu1 %495  ;;  %v1116_v13 = vld [vmem:[#allocation3 + $0x3b0] sm:$0xff] }
  0xce   : > { %1419 = vmatpush1.bf16.msra.mxu1 %v941_v14 }
  0xcf   : > { %v494_v15 = vpop.permute.xlu0 %493  ;;  %706 = vrot.lane.b32.xlu1 %v3451_v23, %s3332_s7 }
  0xd0   : > { %v515_v17 = vsel %vm507_vm4, %v494_v15, %v3690_v16 }
  0xd1   : > { %710 = vrot.lane.b32.xlu0 %v3467_v31, %s3332_s7  ;;  %1282 = vmatprep.subr.bf16.mxu0 %v515_v17  ;;  %v924_v21 = vpop.permute.xlu1 %923 }
  0xd3   : > { %v492_v19 = vpop.permute.xlu0 %491  ;;  %781 = vrot.lane.b32.xlu1 %v3698_v18, %s3333_s8 }
  0xd4   : > { %v514_v29 = vsel %vm507_vm4, %v492_v19, %v494_v15  ;;  %v1115_v19 = vld [vmem:[#allocation3 + $0x3a8] sm:$0xff] }
  0xd5   : > { %779 = vrot.lane.b32.xlu0 %v3467_v31, %s3333_s8  ;;  %1283 = vmatpush1.bf16.msra.mxu0 %v514_v29  ;;  %v922_v35 = vpop.permute.xlu1 %921 }
  0xd6   : > { %v944_v38 = vsel %vm937_vm5, %v922_v35, %v924_v21 }
  0xd7   : > { %v3705_v34 = vpop.permute.xlu0 %925  ;;  %718 = vrot.lane.b32.xlu1 %v3469_v32, %s3332_s7 }
  0xd8   : > { %v945_v37 = vsel %vm937_vm5, %v924_v21, %v3705_v34 }
  0xd9   : > { %716 = vrot.lane.b32.xlu0 %v3457_v26, %s3332_s7  ;;  %1420 = vmatprep.subr.bf16.mxu1 %v945_v37  ;;  %v3714_v41 = vpop.permute.xlu1 %503 }
  0xda   : > { %1421 = vmatpush1.bf16.msra.mxu1 %v944_v38 }
  0xdb   : > { %v502_v39 = vpop.permute.xlu0 %501  ;;  %787 = vrot.lane.b32.xlu1 %v3469_v32, %s3333_s8 }
  0xdc   : > { %v518_v42 = vsel %vm507_vm4, %v502_v39, %v3714_v41 }
  0xdd   : > { %714 = vrot.lane.b32.xlu0 %v3455_v25, %s3332_s7  ;;  %1284 = vmatprep.subr.bf16.mxu0 %v518_v42  ;;  %v932_v46 = vpop.permute.xlu1 %931 }
  0xdf   : > { %v500_v45 = vpop.permute.xlu0 %499  ;;  %724 = vrot.lane.b32.xlu1 %v3461_v28, %s3332_s7 }
  0xe0   : > { %v517_v48 = vsel %vm507_vm4, %v500_v45, %v502_v39 }
  0xe1   : > { %789 = vrot.lane.b32.xlu0 %v3722_v44, %s3333_s8  ;;  %1285 = vmatpush1.bf16.msra.mxu0 %v517_v48  ;;  %v930_v51 = vpop.permute.xlu1 %929 }
  0xe2   : > { %v947_v53 = vsel %vm937_vm5, %v930_v51, %v932_v46 }
  0xe3   : > { %v3729_v50 = vpop.permute.xlu0 %933  ;;  %722 = vrot.lane.b32.xlu1 %v3459_v27, %s3332_s7 }
  0xe4   : > { %v948_v52 = vsel %vm937_vm5, %v932_v46, %v3729_v50 }
  0xe5   : > { %726 = vrot.lane.b32.xlu0 %v3478_v33, %s3332_s7  ;;  %1422 = vmatprep.subr.bf16.mxu1 %v948_v52  ;;  %v3740_v58 = vpop.permute.xlu1 %548 }
  0xe6   : > { %1423 = vmatpush1.bf16.msra.mxu1 %v947_v53 }
  0xe7   : > { %v547_v57 = vpop.permute.xlu0 %546  ;;  %1424 = vmatprep.subr.bf16.mxu1 %v1107_v55  ;;  %797 = vrot.lane.b32.xlu1 %v3738_v56, %s3333_s8 }
  0xe8   : > { %v578_v60 = vsel %vm576_vm6, %v547_v57, %v3740_v58 }
  0xe9   : > { %795 = vrot.lane.b32.xlu0 %v3478_v33, %s3333_s8  ;;  %1286 = vmatprep.subr.bf16.mxu0 %v578_v60  ;;  %v555_v1 = vpop.permute.xlu1 %554 }
  0xea   : > { %1425 = vmatpush1.bf16.msra.mxu1 %v1106_v61  ;;  %v3810_v61 = vld [vmem:[%s3432_s17 + $0x60] ss:$20 sps:$4 sm:$0xff]  }
  0xeb   : > { %v545_v63 = vpop.permute.xlu0 %544  ;;  %1426 = vmatprep.subr.bf16.mxu1 %v1110_v62  ;;  %767 = vrot.lane.b32.xlu1 %v3441_v20, %s3333_s8 }
  0xec   : > { %v577_v2 = vsel %vm576_vm6, %v545_v63, %v547_v57 }
  0xed   : > { %769 = vrot.lane.b32.xlu0 %v3445_v22, %s3333_s8  ;;  %1287 = vmatpush1.bf16.msra.mxu0 %v577_v2  ;;  %v553_v7 = vpop.permute.xlu1 %552 }
  0xee   : > { %1427 = vmatpush1.bf16.msra.mxu1 %v1109_v3  ;;  %v580_v9 = vsel %vm576_vm6, %v553_v7, %v555_v1  ;;  %v3834_v7 = vld [vmem:[%s3432_s17 + $0x88] ss:$20 sps:$4 sm:$0xff]  }
  0xef   : > { %v3753_v6 = vpop.permute.xlu0 %556  ;;  %1428 = vmatprep.subr.bf16.mxu1 %v1113_v4  ;;  %842 = vrot.lane.b32.xlu1 %v3679_v10, %s3334_s9 }
  0xf0   : > { %v581_v8 = vsel %vm576_vm6, %v555_v1, %v3753_v6 }
  0xf1   : > { %840 = vrot.lane.b32.xlu0 %v3465_v30, %s3334_s9  ;;  %1288 = vmatprep.subr.bf16.mxu0 %v581_v8  ;;  %v3762_v15 = vpop.permute.xlu1 %564  ;;  %v3771_v30 = vld [vmem:[%s3432_s17 + $0x10] ss:$20 sps:$4 sm:$0xff]  }
  0xf2   : > { %1289 = vmatpush1.bf16.msra.mxu0 %v580_v9  ;;  %1429 = vmatpush1.bf16.msra.mxu1 %v1112_v12 }
  0xf3   : > { %v563_v14 = vpop.permute.xlu0 %562  ;;  %1430 = vmatprep.subr.bf16.mxu1 %v1116_v13  ;;  %777 = vrot.lane.b32.xlu1 %v3453_v24, %s3333_s8 }
  0xf4   : > { %v584_v17 = vsel %vm576_vm6, %v563_v14, %v3762_v15 }
  0xf5   : > { %704 = vrot.lane.b32.xlu0 %v3679_v10, %s3332_s7  ;;  %1290 = vmatprep.subr.bf16.mxu0 %v584_v17  ;;  %v571_v29 = vpop.permute.xlu1 %570 }
  0xf6   : > { %1431 = vmatpush1.bf16.msra.mxu1 %v1115_v19 }
  0xf7   : > { %v561_v21 = vpop.permute.xlu0 %560  ;;  %848 = vrot.lane.b32.xlu1 %v3467_v31, %s3334_s9  ;;  %v3790_v31 = vld [vmem:[%s3432_s17 + $0x38] ss:$20 sps:$4 sm:$0xff]  }
  0xf8   : > { %v583_v35 = vsel %vm576_vm6, %v561_v21, %v563_v14 }
  0xf9   : > { %775 = vrot.lane.b32.xlu0 %v3451_v23, %s3333_s8  ;;  %1291 = vmatpush1.bf16.msra.mxu0 %v583_v35  ;;  %v569_v38 = vpop.permute.xlu1 %568 }
  0xfa   : > { %1449 = vmatmul.mubr.bf16.vlgmr.msra.gmra.mrb[0].mxu1 %v3771_v30  ;;  %v586_v42 = vsel %vm576_vm6, %v569_v38, %v571_v29  ;;  %v3258_v38 = vld [vmem:[%s3432_s17 + $0x2c] ss:$20 sps:$4 sm:$0xff]  }
  0xfb   : > { %v3779_v37 = vpop.permute.xlu0 %572  ;;  %1458 = vmatprep.mubr.bf16.mxu1 %v3330_v36  ;;  %712 = vrot.lane.b32.xlu1 %v3698_v18, %s3332_s7 }
  0xfc   : > { %v587_v39 = vsel %vm576_vm6, %v571_v29, %v3779_v37 }
  0xfd   : > { %850 = vrot.lane.b32.xlu0 %v3698_v18, %s3334_s9  ;;  %1292 = vmatprep.subr.bf16.mxu0 %v587_v39  ;;  %v3792_v46 = vpop.permute.xlu1 %617 }
  0xfe   : > { %1293 = vmatpush1.bf16.msra.mxu0 %v586_v42 }
  0xff   : > { %v616_v45 = vpop.permute.xlu0 %615  ;;  %783 = vrot.lane.b32.xlu1 %v3455_v25, %s3333_s8 }
 0x100   : > { %v647_v48 = vsel %vm645_vm7, %v616_v45, %v3792_v46 }
 0x101   : > { %785 = vrot.lane.b32.xlu0 %v3457_v26, %s3333_s8  ;;  %1294 = vmatprep.subr.bf16.mxu0 %v647_v48  ;;  %v551_v52 = vpop.permute.xlu1 %550 }
 0x102   : > { %1459 = vmatmul.mubr.bf16.gmra.mrb[4].mxu1 %v3790_v31  ;;  %v579_v55 = vsel %vm576_vm6, %v3740_v58, %v551_v52  ;;  %v3263_v52 = vld [vmem:[%s3432_s17 + $0x50] ss:$20 sps:$4 sm:$0xff]  }
 0x103   : > { %v614_v51 = vpop.permute.xlu0 %613  ;;  %1468 = vmatprep.mubr.bf16.mxu1 %v3330_v36  ;;  %858 = vrot.lane.b32.xlu1 %v3722_v44, %s3334_s9 }
 0x104   : > { %v646_v53 = vsel %vm645_vm7, %v614_v51, %v616_v45  ;;  %2948 = vmatprep.subr.bf16.mxu1 %v579_v55  ;;  %v3261_v45 = vld [vmem:[%s3432_s17 + $0x54] ss:$20 sps:$4 sm:$0xff]  }
 0x105   : > { %856 = vrot.lane.b32.xlu0 %v3469_v32, %s3334_s9  ;;  %1295 = vmatpush1.bf16.msra.mxu0 %v646_v53  ;;  %v624_v60 = vpop.permute.xlu1 %623  ;;  %v1119_v55 = vld [vmem:[%s3427_s14 + $0x8] sm:$0xff] }
 0x107   : > { %v413_v57 = vpop.permute.xlu0 %412  ;;  %793 = vrot.lane.b32.xlu1 %v3461_v28, %s3333_s8 }
 0x108   : > { %v441_v62 = vsel %vm438_vm3, %v3601_v40, %v413_v57 }
 0x109   : > { %720 = vrot.lane.b32.xlu0 %v3722_v44, %s3332_s7  ;;  %2949 = vmatpush3.bf16.msra.mxu1 %v441_v62  ;;  %v622_v58 = vpop.permute.xlu1 %621 }
 0x10a   : > { %1469 = vmatmul.mubr.bf16.gmra.mrb[8].mxu1 %v3810_v61  ;;  %v649_v1 = vsel %vm645_vm7, %v622_v58, %v624_v60  ;;  %v1121_v58 = vld [vmem:[%s3427_s14 + $0x18] sm:$0xff] }
 0x10b   : > { %v3818_v32 = vpop.permute.xlu0 %625  ;;  %1478 = vmatprep.mubr.bf16.mxu1 %v3330_v36  ;;  %864 = vrot.lane.b32.xlu1 %v3478_v33, %s3334_s9 }
 0x10c   : > { %v650_v63 = vsel %vm645_vm7, %v624_v60, %v3818_v32 }
 0x10d   : > { %791 = vrot.lane.b32.xlu0 %v3459_v27, %s3333_s8  ;;  %1296 = vmatprep.subr.bf16.mxu0 %v650_v63  ;;  %v421_v2 = vpop.permute.xlu1 %420  ;;  %v3269_v63 = vld [vmem:[%s3432_s17 + $0xc] ss:$20 sps:$4 sm:$0xff]  }
 0x10e   : > { %1297 = vmatpush1.bf16.msra.mxu0 %v649_v1  ;;  %v444_v4 = vsel %vm438_vm3, %v3609_v43, %v421_v2  ;;  %v1120_v1 = vld [vmem:[%s3427_s14 + $0x10] sm:$0xff] }
 0x10f   : > { %v559_v40 = vpop.permute.xlu0 %558  ;;  %728 = vrot.lane.b32.xlu1 %v3738_v56, %s3332_s7 }
 0x110   : > { %v582_v3 = vsel %vm576_vm6, %v3753_v6, %v559_v40 }
 0x111   : > { %866 = vrot.lane.b32.xlu0 %v3738_v56, %s3334_s9  ;;  %2950 = vmatprep.subr.bf16.mxu1 %v582_v3  ;;  %v3840_v36 = vpop.permute.xlu1 %633  ;;  %v1048_v3 = vld [vmem:[#allocation3 + $0x190] sm:$0xff] }
 0x112   : > { %2951 = vmatpush3.bf16.msra.mxu1 %v444_v4 }
 0x113   : > { %v632_v33 = vpop.permute.xlu0 %631  ;;  %1479 = vmatmul.mubr.bf16.gmra.mrb[12].mxu1 %v3834_v7  ;;  %836 = vrot.lane.b32.xlu1 %v3441_v20, %s3334_s9 }
 0x114   : > { %v653_v8 = vsel %vm645_vm7, %v632_v33, %v3840_v36  ;;  %1521 = vmatprep.mubr.bf16.mxu1 %v3619_v47 }
 0x115   : > { %838 = vrot.lane.b32.xlu0 %v3445_v22, %s3334_s9  ;;  %1298 = vmatprep.subr.bf16.mxu0 %v653_v8  ;;  %v567_v6 = vpop.permute.xlu1 %566 }
 0x116   : > { %v585_v12 = vsel %vm576_vm6, %v3762_v15, %v567_v6 }
 0x117   : > { %v630_v43 = vpop.permute.xlu0 %629  ;;  %846 = vrot.lane.b32.xlu1 %v3453_v24, %s3334_s9  ;;  %2952 = vmatprep.subr.bf16.mxu1 %v585_v12  ;;  %v1125_v12 = vld [vmem:[%s3427_s14 + $0x38] sm:$0xff] }
 0x118   : > { %v652_v9 = vsel %vm645_vm7, %v630_v43, %v632_v33  ;;  %v1123_v33 = vld [vmem:[%s3427_s14 + $0x28] sm:$0xff] }
 0x119   : > { %911 = vrot.lane.b32.xlu0 %v3679_v10, %s3328_s24  ;;  %1299 = vmatpush1.bf16.msra.mxu0 %v652_v9  ;;  %v640_v14 = vpop.permute.xlu1 %639 }
 0x11b   : > { %v429_v13 = vpop.permute.xlu0 %428  ;;  %919 = vrot.lane.b32.xlu1 %v3698_v18, %s3328_s24 }
 0x11c   : > { %v447_v47 = vsel %vm438_vm3, %v3621_v49, %v429_v13  ;;  %v3252_v49 = vld [vmem:[%s3432_s17] ss:$20 sps:$4 sm:$0xff]  }
 0x11d   : > { %844 = vrot.lane.b32.xlu0 %v3451_v23, %s3334_s9  ;;  %2953 = vmatpush3.bf16.msra.mxu1 %v447_v47  ;;  %v638_v10 = vpop.permute.xlu1 %637  ;;  %v1124_v13 = vld [vmem:[%s3427_s14 + $0x30] sm:$0xff] }
 0x11e   : > { %v655_v19 = vsel %vm645_vm7, %v638_v10, %v640_v14 }
 0x11f   : > { %v642_v15 = vpop.permute.xlu0 %641  ;;  %852 = vrot.lane.b32.xlu1 %v3455_v25, %s3334_s9 }
 0x120   : > { %v656_v17 = vsel %vm645_vm7, %v640_v14, %v642_v15 }
 0x121   : > { %854 = vrot.lane.b32.xlu0 %v3457_v26, %s3334_s9  ;;  %1300 = vmatprep.subr.bf16.mxu0 %v656_v17  ;;  %v437_v29 = vpop.permute.xlu1 %436 }
 0x122   : > { %1301 = vmatpush1.bf16.msra.mxu0 %v655_v19  ;;  %v450_v35 = vsel %vm438_vm3, %v3635_v54, %v437_v29 }
 0x123   : > { %v575_v21 = vpop.permute.xlu0 %574  ;;  %1343 = vmatprep.subr.bf16.mxu0 %v3445_v22  ;;  %862 = vrot.lane.b32.xlu1 %v3461_v28, %s3334_s9 }
 0x124   : > { %v588_v18 = vsel %vm576_vm6, %v3779_v37, %v575_v21 }
 0x125   : > { %927 = vrot.lane.b32.xlu0 %v3722_v44, %s3328_s24  ;;  %2954 = vmatprep.subr.bf16.mxu1 %v588_v18  ;;  %v482_v42 = vpop.permute.xlu1 %481 }
 0x126   : > { %1303 = vmatmul.mubr.bf16.vlgmr.msra.gmra.mrb[0].mxu0 %v3252_v49  ;;  %2955 = vmatpush3.bf16.msra.mxu1 %v450_v35  ;;  %v510_v22 = vsel %vm507_vm4, %v3644_v59, %v482_v42 }
 0x127   : > { %v620_v39 = vpop.permute.xlu0 %619  ;;  %1344 = vmatpush1.bf16.msra.mxu0 %v3441_v20  ;;  %1312 = vmatprep.mubr.bf16.mxu0 %v3258_v38 }
 0x128   : > { %v648_v54 = vsel %vm645_vm7, %v3792_v46, %v620_v39  ;;  %1345 = vmatprep.subr.bf16.mxu0 %v3453_v24  ;;  %935 = vrot.lane.b32.xlu1 %v3738_v56, %s3328_s24  ;;  %v3260_v24 = vld [vmem:[%s3432_s17 + $0x28] ss:$20 sps:$4 sm:$0xff]   ;;  %v1054_v39 = vld [vmem:[#allocation3 + $0x1c0] sm:$0xff] }
 0x129   : > { %860 = vrot.lane.b32.xlu0 %v3459_v27, %s3334_s9  ;;  %2956 = vmatprep.subr.bf16.mxu1 %v648_v54  ;;  %v490_v37 = vpop.permute.xlu1 %489 }
 0x12a   : > { %2957 = vmatpush3.bf16.msra.mxu1 %v510_v22  ;;  %v513_v59 = vsel %vm507_vm4, %v3666_v5, %v490_v37 }
 0x12b   : > { %v628_v44 = vpop.permute.xlu0 %627  ;;  %1346 = vmatpush1.bf16.msra.mxu0 %v3451_v23 }
 0x12c   : > { %v651_v20 = vsel %vm645_vm7, %v3818_v32, %v628_v44  ;;  %1347 = vmatprep.subr.bf16.mxu0 %v3457_v26  ;;  %v3266_v32 = vld [vmem:[%s3432_s17 + $0x78] ss:$20 sps:$4 sm:$0xff]   ;;  %1133 = vperm.xlu1 %3250, %v1119_v55  }
 0x12d   : > { %2958 = vmatprep.subr.bf16.mxu1 %v651_v20  ;;  %v498_v46 = vpop.permute.xlu1 %497 }
 0x12e   : > { %1313 = vmatmul.mubr.bf16.gmra.mrb[4].mxu0 %v3260_v24  ;;  %2959 = vmatpush3.bf16.msra.mxu1 %v513_v59  ;;  %v516_v48 = vsel %vm507_vm4, %v3690_v16, %v498_v46  ;;  %v3264_v16 = vld [vmem:[%s3432_s17 + $0x7c] ss:$20 sps:$4 sm:$0xff]  }
 0x12f   : > { %v636_v56 = vpop.permute.xlu0 %635  ;;  %1348 = vmatpush1.bf16.msra.mxu0 %v3455_v25  ;;  %1322 = vmatprep.mubr.bf16.mxu0 %v3261_v45 }
 0x130   : > { %v654_v23 = vsel %vm645_vm7, %v3840_v36, %v636_v56  ;;  %1349 = vmatprep.subr.bf16.mxu0 %v3461_v28  ;;  %1138 = vperm.xlu1 %3250, %v1120_v1   ;;  %v1122_v36 = vld [vmem:[%s3427_s14 + $0x20] sm:$0xff] }
 0x131   : > { %2960 = vmatprep.subr.bf16.mxu1 %v654_v23  ;;  %v506_v5 = vpop.permute.xlu1 %505 }
 0x132   : > { %2961 = vmatpush3.bf16.msra.mxu1 %v516_v48  ;;  %v519_v25 = vsel %vm507_vm4, %v3714_v41, %v506_v5  ;;  %v1118_v41 = vld [vmem:[%s3427_s14] sm:$0xff]  ;;  %s3337_s14 = smov (!%p2939_p8), 127  }
 0x133   : > { %v644_v26 = vpop.permute.xlu0 %643  ;;  %1350 = vmatpush1.bf16.msra.mxu0 %v3459_v27  ;;  %1128 = vperm.xlu0 %3249, %v1118_v41  }
 0x134   : > { %v657_v51 = vsel %vm645_vm7, %v642_v15, %v644_v26  ;;  %1148 = vperm.xlu1 %3250, %v1122_v36   ;;  %v1051_v15 = vld [vmem:[#allocation3 + $0x1a8] sm:$0xff] }
 0x135   : > { %2962 = vmatprep.subr.bf16.mxu1 %v657_v51  ;;  %v3910_v53 = vpop.permute.xlu1 %702 }
 0x136   : > { %1323 = vmatmul.mubr.bf16.gmra.mrb[8].mxu0 %v3263_v52  ;;  %2963 = vmatpush3.bf16.msra.mxu1 %v519_v25 }
 0x137   : > { %v701_v28 = vpop.permute.xlu0 %700  ;;  %1332 = vmatprep.mubr.bf16.mxu0 %v3264_v16  ;;  %1143 = vperm.xlu0 %3249, %v1121_v58  }
 0x138   : > { %v732_v27 = vsel %vm730_vm8, %v701_v28, %v3910_v53  ;;  %1158 = vperm.xlu1 %3250, %v1124_v13  }
 0x139   : > { %1351 = vmatprep.subr.bf16.mxu0 %v732_v27  ;;  %1522 = vmatmul.mubr.bf16.vlgmr.msra.gmra.mrb[16].mxu1 %v3252_v49  ;;  %v3916_v60 = vpop.permute.xlu1 %771 }
 0x13a   : > { %1529 = vmatprep.mubr.bf16.mxu1 %v3258_v38 }
 0x13b   : > { %v699_v57 = vpop.permute.xlu0 %698  ;;  %1153 = vperm.xlu0 %3249, %v1123_v33  }
 0x13c   : > { %v731_v62 = vsel %vm730_vm8, %v699_v57, %v701_v28 }
 0x13d   : > { %1352 = vmatpush1.bf16.msra.mxu0 %v731_v62  ;;  %v709_v2 = vpop.permute.xlu1 %708 }
 0x13e   : > { %1333 = vmatmul.mubr.bf16.gmra.mrb[12].mxu0 %v3266_v32 }
 0x13f   : > { %v774_v40 = vpop.permute.xlu0 %773  ;;  %1375 = vmatprep.mubr.bf16.mxu0 %v3269_v63  ;;  %1163 = vperm.xlu0 %3249, %v1125_v12  }
 0x140   : > { %v802_v4 = vsel %vm799_vm9, %v3916_v60, %v774_v40 }
 0x141   : > { %2988 = vmatprep.subr.bf16.mxu1 %v802_v4  ;;  %v707_v43 = vpop.permute.xlu1 %706  ;;  %1530 = vmatmul.mubr.bf16.gmra.mrb[20].mxu1 %v3260_v24  ;;  %v1057_v24 = vld [vmem:[#allocation3 + $0x1d8] sm:$0xff] }
 0x142   : > { %2989 = vmatpush3.bf16.msra.mxu1 %v1048_v3  ;;  %v734_v9 = vsel %vm730_vm8, %v707_v43, %v709_v2  ;;  %1537 = vmatprep.mubr.bf16.mxu1 %v3261_v45 }
 0x143   : > { %v3927_v8 = vpop.permute.xlu0 %710 }
 0x144   : > { %v735_v6 = vsel %vm730_vm8, %v709_v2, %v3927_v8 }
 0x145   : > { %1353 = vmatprep.subr.bf16.mxu0 %v735_v6  ;;  %v782_v47 = vpop.permute.xlu1 %781 }
 0x146   : > { %1354 = vmatpush1.bf16.msra.mxu0 %v734_v9 }
 0x147   : > { %v780_v14 = vpop.permute.xlu0 %779 }
 0x148   : > { %v805_v10 = vsel %vm799_vm9, %v780_v14, %v782_v47 }
 0x149   : > { %2990 = vmatprep.subr.bf16.mxu1 %v805_v10  ;;  %v3935_v19 = vpop.permute.xlu1 %718  ;;  %1538 = vmatmul.mubr.bf16.gmra.mrb[24].mxu1 %v3263_v52  ;;  %v3270_v10 = vld [vmem:[%s3432_s17 + $0x34] ss:$20 sps:$4 sm:$0xff]  }
 0x14a   : > { %2991 = vmatpush3.bf16.msra.mxu1 %v1051_v15  ;;  %1545 = vmatprep.mubr.bf16.mxu1 %v3264_v16  ;;  %v3267_v15 = vld [vmem:[%s3432_s17 + $0x8] ss:$20 sps:$4 sm:$0xff]  }
 0x14b   : > { %v717_v17 = vpop.permute.xlu0 %716 }
 0x14c   : > { %v738_v49 = vsel %vm730_vm8, %v717_v17, %v3935_v19 }
 0x14d   : > { %1355 = vmatprep.subr.bf16.mxu0 %v738_v49  ;;  %v788_v29 = vpop.permute.xlu1 %787 }
 0x14f   : > { %v715_v21 = vpop.permute.xlu0 %714 }
 0x150   : > { %v737_v18 = vsel %vm730_vm8, %v715_v21, %v717_v17 }
 0x151   : > { %1356 = vmatpush1.bf16.msra.mxu0 %v737_v18  ;;  %v725_v38 = vpop.permute.xlu1 %724  ;;  %1546 = vmatmul.mubr.bf16.gmra.mrb[28].mxu1 %v3266_v32 }
 0x152   : > { %1586 = vmatprep.mubr.bf16.mxu1 %v3269_v63 }
 0x153   : > { %v790_v35 = vpop.permute.xlu0 %789 }
 0x154   : > { %v808_v42 = vsel %vm799_vm9, %v788_v29, %v790_v35 }
 0x155   : > { %2992 = vmatprep.subr.bf16.mxu1 %v808_v42  ;;  %v723_v22 = vpop.permute.xlu1 %722  ;;  %v3273_v42 = vld [vmem:[%s3432_s17 + $0x5c] ss:$20 sps:$4 sm:$0xff]  }
 0x156   : > { %2993 = vmatpush3.bf16.msra.mxu1 %v1054_v39  ;;  %v740_v37 = vsel %vm730_vm8, %v723_v22, %v725_v38  ;;  %v3272_v39 = vld [vmem:[%s3432_s17 + $0x30] ss:$20 sps:$4 sm:$0xff]  }
 0x157   : > { %v3941_v54 = vpop.permute.xlu0 %726 }
 0x158   : > { %v741_v44 = vsel %vm730_vm8, %v725_v38, %v3941_v54 }
 0x159   : > { %1357 = vmatprep.subr.bf16.mxu0 %v741_v44  ;;  %v798_v59 = vpop.permute.xlu1 %797 }
 0x15a   : > { %1358 = vmatpush1.bf16.msra.mxu0 %v740_v37 }
 0x15b   : > { %v796_v20 = vpop.permute.xlu0 %795 }
 0x15c   : > { %v811_v45 = vsel %vm799_vm9, %v796_v20, %v798_v59 }
 0x15d   : > { %2994 = vmatprep.subr.bf16.mxu1 %v811_v45  ;;  %v768_v46 = vpop.permute.xlu1 %767  ;;  %v3275_v45 = vld [vmem:[%s3432_s17 + $0x58] ss:$20 sps:$4 sm:$0xff]  }
 0x15e   : > { %2995 = vmatpush3.bf16.msra.mxu1 %v1057_v24 }
 0x15f   : > { %v770_v56 = vpop.permute.xlu0 %769 }
 0x160   : > { %v801_v23 = vsel %vm799_vm9, %v770_v56, %v3916_v60  ;;  %v800_v48 = vsel %vm799_vm9, %v768_v46, %v770_v56  ;;  %v3276_v56 = vld [vmem:[%s3432_s17 + $0x84] ss:$20 sps:$4 sm:$0xff]  }
 0x161   : > { %1359 = vmatprep.subr.bf16.mxu0 %v801_v23  ;;  %v843_v5 = vpop.permute.xlu1 %842 }
 0x162   : > { %1360 = vmatpush1.bf16.msra.mxu0 %v800_v48 }
 0x163   : > { %v841_v26 = vpop.permute.xlu0 %840 }
 0x164   : > { %v871_v51 = vsel %vm868_vm10, %v841_v26, %v843_v5 }
 0x165   : > { %2996 = vmatprep.subr.bf16.mxu1 %v871_v51  ;;  %v778_v52 = vpop.permute.xlu1 %777 }
 0x166   : > { %v804_v28 = vsel %vm799_vm9, %v778_v52, %v780_v14 }
 0x167   : > { %v705_v25 = vpop.permute.xlu0 %704  ;;  %1361 = vmatprep.subr.bf16.mxu0 %v804_v28  ;;  %v1114_v28 = vld [vmem:[#allocation3 + $0x3a0] sm:$0xff] }
 0x168   : > { %v733_v16 = vsel %vm730_vm8, %v3910_v53, %v705_v25 }
 0x169   : > { %2997 = vmatpush3.bf16.msra.mxu1 %v733_v16  ;;  %v849_v41 = vpop.permute.xlu1 %848  ;;  %v1108_v16 = vld [vmem:[#allocation3 + $0x370] sm:$0xff] }
 0x16b   : > { %v776_v27 = vpop.permute.xlu0 %775 }
 0x16c   : > { %v803_v55 = vsel %vm799_vm9, %v776_v27, %v778_v52  ;;  %v3278_v52 = vld [vmem:[%s3432_s17 + $0x80] ss:$20 sps:$4 sm:$0xff]   ;;  %v1117_v27 = vld [vmem:[#allocation3 + $0x3b8] sm:$0xff]  ;;  %s3340_s17 = smov (!%p2939_p8), 1  }
 0x16d   : > { %1362 = vmatpush1.bf16.msra.mxu0 %v803_v55  ;;  %v713_v60 = vpop.permute.xlu1 %712 }
 0x16e   : > { %v736_v32 = vsel %vm730_vm8, %v3927_v8, %v713_v60 }
 0x16f   : > { %v851_v57 = vpop.permute.xlu0 %850 }
 0x170   : > { %v874_v62 = vsel %vm868_vm10, %v849_v41, %v851_v57 }
 0x171   : > { %2998 = vmatprep.subr.bf16.mxu1 %v874_v62  ;;  %v784_v53 = vpop.permute.xlu1 %783 }
 0x172   : > { %2999 = vmatpush3.bf16.msra.mxu1 %v736_v32 }
 0x173   : > { %v786_v58 = vpop.permute.xlu0 %785 }
 0x174   : > { %v807_v63 = vsel %vm799_vm9, %v786_v58, %v788_v29  ;;  %v806_v1 = vsel %vm799_vm9, %v784_v53, %v786_v58 }
 0x175   : > { %1363 = vmatprep.subr.bf16.mxu0 %v807_v63  ;;  %v859_v2 = vpop.permute.xlu1 %858 }
 0x176   : > { %1364 = vmatpush1.bf16.msra.mxu0 %v806_v1 }
 0x177   : > { %v857_v40 = vpop.permute.xlu0 %856 }
 0x178   : > { %v877_v3 = vsel %vm868_vm10, %v857_v40, %v859_v2 }
 0x179   : > { %3000 = vmatprep.subr.bf16.mxu1 %v877_v3  ;;  %v794_v33 = vpop.permute.xlu1 %793 }
 0x17a   : > { %v810_v8 = vsel %vm799_vm9, %v794_v33, %v796_v20 }
 0x17b   : > { %v721_v4 = vpop.permute.xlu0 %720  ;;  %1365 = vmatprep.subr.bf16.mxu0 %v810_v8 }
 0x17c   : > { %v739_v36 = vsel %vm730_vm8, %v3935_v19, %v721_v4 }
 0x17d   : > { %3001 = vmatpush3.bf16.msra.mxu1 %v739_v36  ;;  %v865_v6 = vpop.permute.xlu1 %864 }
 0x17f   : > { %v792_v43 = vpop.permute.xlu0 %791 }
 0x180   : > { %v809_v9 = vsel %vm799_vm9, %v792_v43, %v794_v33 }
 0x181   : > { %1366 = vmatpush1.bf16.msra.mxu0 %v809_v9  ;;  %v729_v13 = vpop.permute.xlu1 %728 }
 0x182   : > { %v742_v47 = vsel %vm730_vm8, %v3941_v54, %v729_v13 }
 0x183   : > { %v867_v12 = vpop.permute.xlu0 %866 }
 0x184   : > { %v880_v14 = vsel %vm868_vm10, %v865_v6, %v867_v12 }
 0x185   : > { %3002 = vmatprep.subr.bf16.mxu1 %v880_v14  ;;  %v837_v19 = vpop.permute.xlu1 %836 }
 0x186   : > { %3003 = vmatpush3.bf16.msra.mxu1 %v742_v47 }
 0x187   : > { %v839_v17 = vpop.permute.xlu0 %838 }
 0x188   : > { %v870_v49 = vsel %vm868_vm10, %v839_v17, %v841_v26  ;;  %v869_v21 = vsel %vm868_vm10, %v837_v19, %v839_v17 }
 0x189   : > { %1367 = vmatprep.subr.bf16.mxu0 %v870_v49  ;;  %1587 = vmatmul.mubr.bf16.vlgmr.msra.gmra.mrb[32].mxu1 %v3267_v15  ;;  %v847_v18 = vpop.permute.xlu1 %846 }
 0x18a   : > { %1368 = vmatpush1.bf16.msra.mxu0 %v869_v21  ;;  %1594 = vmatprep.mubr.bf16.mxu1 %v3270_v10  ;;  %v873_v38 = vsel %vm868_vm10, %v847_v18, %v849_v41 }
 0x18b   : > { %v912_v29 = vpop.permute.xlu0 %911  ;;  %1369 = vmatprep.subr.bf16.mxu0 %v873_v38 }
 0x18c   : > { %v940_v35 = vsel %vm937_vm5, %v3657_v0, %v912_v29 }
 0x18d   : > { %3093 = vmatprep.subr.bf16.mxu1 %v940_v35  ;;  %v920_v22 = vpop.permute.xlu1 %919 }
 0x18e   : > { %3094 = vmatpush3.bf16.msra.mxu1 %v940_v35  ;;  %v943_v37 = vsel %vm937_vm5, %v3681_v11, %v920_v22 }
 0x18f   : > { %v845_v54 = vpop.permute.xlu0 %844  ;;  %3095 = vmatprep.subr.bf16.mxu1 %v943_v37 }
 0x190   : > { %v872_v44 = vsel %vm868_vm10, %v845_v54, %v847_v18 }
 0x191   : > { %1370 = vmatpush1.bf16.msra.mxu0 %v872_v44  ;;  %1595 = vmatmul.mubr.bf16.gmra.mrb[36].mxu1 %v3272_v39  ;;  %v853_v20 = vpop.permute.xlu1 %852 }
 0x192   : > { %1602 = vmatprep.mubr.bf16.mxu1 %v3273_v42  ;;  %3096 = vmatpush3.bf16.msra.mxu1 %v943_v37 }
 0x193   : > { %v855_v0 = vpop.permute.xlu0 %854 }
 0x194   : > { %v876_v59 = vsel %vm868_vm10, %v855_v0, %v857_v40  ;;  %v875_v24 = vsel %vm868_vm10, %v853_v20, %v855_v0 }
 0x195   : > { %1371 = vmatprep.subr.bf16.mxu0 %v876_v59  ;;  %v863_v23 = vpop.permute.xlu1 %862 }
 0x196   : > { %1372 = vmatpush1.bf16.msra.mxu0 %v875_v24  ;;  %v879_v48 = vsel %vm868_vm10, %v863_v23, %v865_v6 }
 0x197   : > { %v928_v46 = vpop.permute.xlu0 %927  ;;  %1373 = vmatprep.subr.bf16.mxu0 %v879_v48 }
 0x198   : > { %v946_v11 = vsel %vm937_vm5, %v3705_v34, %v928_v46  ;;  %v1111_v34 = vld [vmem:[#allocation3 + $0x388] sm:$0xff] }
 0x199   : > { %1603 = vmatmul.mubr.bf16.gmra.mrb[40].mxu1 %v3275_v45  ;;  %3097 = vmatprep.subr.bf16.mxu1 %v946_v11 }
 0x19a   : > { %1610 = vmatprep.mubr.bf16.mxu1 %v3276_v56  ;;  %v936_v5 = vpop.permute.xlu1 %935  ;;  %3098 = vmatpush3.bf16.msra.mxu1 %v946_v11 }
 0x19b   : > { %v861_v26 = vpop.permute.xlu0 %860  ;;  %v949_v25 = vsel %vm937_vm5, %v3729_v50, %v936_v5 }
 0x19c   : > { %v878_v51 = vsel %vm868_vm10, %v861_v26, %v863_v23  ;;  %3099 = vmatprep.subr.bf16.mxu1 %v949_v25 }
 0x19d   : > { %1374 = vmatpush1.bf16.msra.mxu0 %v878_v51 }
 0x19e   : > { %3100 = vmatpush3.bf16.msra.mxu1 %v949_v25 }
 0x19f   : > { %3101 = vmatprep.subr.bf16.mxu1 %v1108_v16 }
 0x1a0   : > { %1376 = vmatmul.mubr.bf16.vlgmr.msra.gmra.mrb[0].mxu0 %v3267_v15 }
 0x1a1   : > { %1611 = vmatmul.mubr.bf16.gmra.mrb[44].mxu1 %v3278_v52  ;;  %1385 = vmatprep.mubr.bf16.mxu0 %v3270_v10 }
 0x1a2   : > { %3109 = vmatprep.mubr.bf16.mxu1 %v3771_v30  ;;  %3102 = vmatpush3.bf16.msra.mxu1 %v1108_v16 }
 0x1a3   : > { %3103 = vmatprep.subr.bf16.mxu1 %v1111_v34 }
 0x1a6   : > { %3104 = vmatpush3.bf16.msra.mxu1 %v1111_v34 }
 0x1a7   : > { %3105 = vmatprep.subr.bf16.mxu1 %v1114_v28 }
 0x1a8   : > { %1386 = vmatmul.mubr.bf16.gmra.mrb[4].mxu0 %v3272_v39 }
 0x1a9   : > { %1395 = vmatprep.mubr.bf16.mxu0 %v3273_v42 }
 0x1aa   : > { %3106 = vmatpush3.bf16.msra.mxu1 %v1114_v28 }
 0x1ab   : > { %3107 = vmatprep.subr.bf16.mxu1 %v1117_v27  ;;  %v1134_v22 = vpop.permute.xlu1 %1133 }
 0x1ae   : > { %3108 = vmatpush3.bf16.msra.mxu1 %v1117_v27 }
 0x1af   : > { %v4031_v23 = vpop.permute.xlu1 %1138 }
 0x1b0   : > { %1396 = vmatmul.mubr.bf16.gmra.mrb[8].mxu0 %v3275_v45 }
 0x1b1   : > { %1405 = vmatprep.mubr.bf16.mxu0 %v3276_v56  ;;  %3110 = vmatmul.mubr.bf16.vlgmr.msra.gmra.mrb[48].mxu1 %v3790_v31 }
 0x1b2   : > { %3113 = vmatprep.mubr.bf16.mxu1 %v3810_v61  ;;  %v1129_v42 = vpop.permute.xlu0 %1128 }
 0x1b6   : > { %v4033_v48 = vpop.permute.xlu0 %1143 }
 0x1b8   : > { %1406 = vmatmul.mubr.bf16.gmra.mrb[12].mxu0 %v3278_v52 }
 0x1b9   : > { %3114 = vmatmul.mubr.bf16.gmra.mrb[52].mxu1 %v3834_v7 }
 0x1cd   : > { %v3995_v50 = vpop.f32.mrb[0].mxu1 }
 0x1ce   : > { %v3997_v30 = vpop.f32.mrb[1].mxu1 }
 0x1cf   : > { %v3999_v41 = vpop.f32.mrb[2].mxu1 }
 0x1d0   : > { %v4001_v55 = vpop.f32.mrb[3].mxu1 }
 0x1d5   : > { %v4003_v57 = vpop.f32.mrb[4].mxu1 }
 0x1d6   : > { %v4005_v60 = vpop.f32.mrb[5].mxu1 }
 0x1d7   : > { %v4007_v62 = vpop.f32.mrb[6].mxu1 }
 0x1d8   : > { %v4009_v31 = vpop.f32.mrb[7].mxu1 }
 0x1dd   : > { %v4011_v61 = vpop.f32.mrb[8].mxu1 }
 0x1de   : > { %v4013_v32 = vpop.f32.mrb[9].mxu1 }
 0x1df   : > { %v4015_v7 = vpop.f32.mrb[10].mxu1 }
 0x1e0   : > { %v4017_v58 = vpop.f32.mrb[11].mxu1 }
 0x1e6   : > { %v4019_v53 = vpop.f32.mrb[12].mxu1 }
 0x1e7   : > { %v4021_v63 = vpop.f32.mrb[13].mxu1 }
 0x1e8   : > { %v4023_v1 = vpop.f32.mrb[14].mxu1 }
 0x1e9   : > { %v4025_v40 = vpop.f32.mrb[15].mxu1 }
 0x20c   : > { %v2964_v2 = vpop.f32.mrb[16].mxu1 }
 0x20d   : > { %v2965_v3 = vpop.f32.mrb[17].mxu1 }
 0x20e   : > { %v2966_v4 = vadd.f32 %v2965_v3, %v2964_v2  ;;  %v2967_v33 = vpop.f32.mrb[18].mxu1  ;;  %v4041_v2 = vpop.permute.xlu1 %1148  ;;  %v1710_v3 = vlaneseq }
 0x20f   : > { %v2968_v36 = vpop.f32.mrb[19].mxu1 }
 0x210   : > { %v2969_v8 = vadd.f32 %v2968_v36, %v2967_v33  ;;  %v1524_v37 = vadd.f32 %v2966_v4, %v1129_v42  ;;  %v4043_v33 = vpop.permute.xlu0 %1153  ;;  %vm2819_vm12 = vcmp.lt.s32.totalorder (!%p2939_p8), %v1710_v3, 384 }
 0x212   : > { %v1527_v24 = vadd.f32 %v2969_v8, %v1134_v22 }
 0x214   : > { %v2970_v43 = vpop.f32.mrb[20].mxu1 }
 0x215   : > { %v2971_v6 = vpop.f32.mrb[21].mxu1 }
 0x216   : > { %v2972_v9 = vadd.f32 %v2971_v6, %v2970_v43  ;;  %v2973_v12 = vpop.f32.mrb[22].mxu1 }
 0x217   : > { %v2974_v13 = vpop.f32.mrb[23].mxu1 }
 0x218   : > { %v2975_v14 = vadd.f32 %v2974_v13, %v2973_v12  ;;  %v1532_v5 = vadd.f32 %v2972_v9, %v4031_v23  ;;  %v4047_v12 = vshrl.u32 %v1710_v3, 7 }
 0x21a   : > { %v1535_v16 = vadd.f32 %v2975_v14, %v4033_v48 }
 0x21c   : > { %v2976_v47 = vpop.f32.mrb[24].mxu1 }
 0x21d   : > { %v2977_v15 = vpop.f32.mrb[25].mxu1 }
 0x21e   : > { %v2978_v10 = vadd.f32 %v2977_v15, %v2976_v47  ;;  %v2979_v17 = vpop.f32.mrb[26].mxu1  ;;  %v4052_v15 = vpop.permute.xlu0 %1163 }
 0x21f   : > { %v2980_v19 = vpop.f32.mrb[27].mxu1 }
 0x220   : > { %v2981_v49 = vadd.f32 %v2980_v19, %v2979_v17  ;;  %v1540_v8 = vadd.f32 %v2978_v10, %v4041_v2  ;;  %v4056_v19 = vpop.permute.xlu1 %1158  ;;  %v4059_v10 = vsub.s32 0, %v4047_v12 }
 0x222   : > { %v1543_v13 = vadd.f32 %v2981_v49, %v4043_v33 }
 0x224   : > { %v2982_v21 = vpop.f32.mrb[28].mxu1 }
 0x225   : > { %v2983_v29 = vpop.f32.mrb[29].mxu1 }
 0x226   : > { %v2984_v18 = vadd.f32 %v2983_v29, %v2982_v21  ;;  %v2985_v35 = vpop.f32.mrb[30].mxu1 }
 0x227   : > { %v2986_v38 = vpop.f32.mrb[31].mxu1 }
 0x228   : > { %v2987_v39 = vadd.f32 %v2986_v38, %v2985_v35  ;;  %v1708_v35 = vld [vmem:[%s4725_s5] sm:$0x7] }
 0x25c   : > { %v3004_v54 = vpop.f32.mrb[32].mxu1 }
 0x25d   : > { %v3005_v44 = vpop.f32.mrb[33].mxu1 }
 0x25e   : > { %v3006_v0 = vadd.f32 %v3005_v44, %v3004_v54  ;;  %v3007_v20 = vpop.f32.mrb[34].mxu1  ;;  %v1716_v44 = vsub.s32 1, %v4047_v12 }
 0x25f   : > { %v3008_v59 = vpop.f32.mrb[35].mxu1 }
 0x260   : > { %v3009_v45 = vadd.f32 %v3008_v59, %v3007_v20  ;;  %v4027_v56 = vadd.f32 %v3006_v0, %v1524_v37  ;;  %v1548_v20 = vadd.f32 %v2984_v18, %v4056_v19 }
 0x262   : > { %v4029_v46 = vadd.f32 %v3009_v45, %v1527_v24 }
 0x264   : > { %v3010_v11 = vpop.f32.mrb[36].mxu1 }
 0x265   : > { %v3011_v26 = vpop.f32.mrb[37].mxu1 }
 0x266   : > { %v3012_v51 = vadd.f32 %v3011_v26, %v3010_v11  ;;  %v3013_v25 = vpop.f32.mrb[38].mxu1 }
 0x267   : > { %v3014_v52 = vpop.f32.mrb[39].mxu1 }
 0x268   : > { %v3015_v34 = vadd.f32 %v3014_v52, %v3013_v25  ;;  %v4037_v28 = vadd.f32 %v3012_v51, %v1532_v5  ;;  %v1551_v5 = vadd.f32 %v2987_v39, %v4052_v15  ;;  %v4069_v51 = vrot.slane %v1708_v35, %v4059_v10 }
 0x26a   : > { %v4039_v27 = vadd.f32 %v3015_v34, %v1535_v16 }
 0x26c   : > { %v3016_v4 = vpop.f32.mrb[40].mxu1 }
 0x26d   : > { %v3017_v36 = vpop.f32.mrb[41].mxu1 }
 0x26e   : > { %v3018_v43 = vadd.f32 %v3017_v36, %v3016_v4  ;;  %v3019_v6 = vpop.f32.mrb[42].mxu1  ;;  %v4077_v36 = vrot.slane %v1708_v35, %v1716_v44 }
 0x26f   : > { %v3020_v9 = vpop.f32.mrb[43].mxu1 }
 0x270   : > { %v3021_v14 = vadd.f32 %v3020_v9, %v3019_v6  ;;  %v4050_v47 = vadd.f32 %v3018_v43, %v1540_v8 }
 0x272   : > { %v4054_v17 = vadd.f32 %v3021_v14, %v1543_v13 }
 0x273   : > { %v1377_v21 = vpop.f32.mrb[0].mxu0 }
 0x274   : > { %v3137_v29 = vadd.f32 %v1377_v21, %v1129_v42  ;;  %v1379_v38 = vpop.f32.mrb[1].mxu0  ;;  %v3022_v49 = vpop.f32.mrb[44].mxu1 }
 0x275   : > { %v3139_v54 = vadd.f32 %v1379_v38, %v1129_v42  ;;  %v1381_v37 = vpop.f32.mrb[2].mxu0  ;;  %v3023_v0 = vpop.f32.mrb[45].mxu1 }
 0x276   : > { %v3138_v59 = vadd.f32 %v3137_v29, %v3995_v50  ;;  %v3141_v24 = vadd.f32 %v1381_v37, %v1134_v22  ;;  %v3024_v45 = vadd.f32 %v3023_v0, %v3022_v49  ;;  %v1383_v11 = vpop.f32.mrb[3].mxu0  ;;  %v3025_v26 = vpop.f32.mrb[46].mxu1 }
 0x277   : > { %v3140_v25 = vadd.f32 %v3139_v54, %v3997_v30  ;;  %v3143_v42 = vadd.f32 %v1383_v11, %v1134_v22  ;;  %v3026_v52 = vpop.f32.mrb[47].mxu1 }
 0x278   : > { %v1684_v16 = vmax.f32 %v3138_v59, 0.0  ;;  %v3142_v34 = vadd.f32 %v3141_v24, %v3999_v41  ;;  %v3027_v4 = vadd.f32 %v3026_v52, %v3025_v26  ;;  %v4073_v18 = vadd.f32 %v3024_v45, %v1548_v20 }
 0x279   : > { %v1685_v50 = vmax.f32 %v3140_v25, 0.0  ;;  %v3144_v39 = vadd.f32 %v3143_v42, %v4001_v55  ;;  %v1720_v26 = vsub.s32 2, %v4047_v12 }
 0x27a   : > { %v1687_v8 = vmax.f32 %v3142_v34, 0.0  ;;  %v4080_v43 = vadd.f32 %v3027_v4, %v1551_v5  ;;  %v1725_v22 = vmul.f32 %v4069_v51, %v1684_v16 }
 0x27b   : > { %v1688_v6 = vmax.f32 %v3144_v39, 0.0  ;;  %v1387_v30 = vpop.f32.mrb[4].mxu0  ;;  %v1726_v14 = vmul.f32 %v4077_v36, %v1685_v50 }
 0x27c   : > { %v1728_v9 = vmul.f32 %v4069_v51, %v1687_v8  ;;  %v3145_v41 = vadd.f32 %v1387_v30, %v4031_v23  ;;  %v1389_v13 = vpop.f32.mrb[5].mxu0 }
 0x27d   : > { %v1729_v21 = vmul.f32 %v4077_v36, %v1688_v6  ;;  %v3147_v29 = vadd.f32 %v1389_v13, %v4031_v23  ;;  %v1391_v38 = vpop.f32.mrb[6].mxu0 }
 0x27e   : > { %v1749_v55 = vpack.c.bf16 %v1728_v9, %v1725_v22  ;;  %v3146_v49 = vadd.f32 %v3145_v41, %v4003_v57  ;;  %v3149_v54 = vadd.f32 %v1391_v38, %v4033_v48  ;;  %v1393_v37 = vpop.f32.mrb[7].mxu0 }
 0x27f   : > { %v1750_v0 = vpack.c.bf16 %v1729_v21, %v1726_v14  ;;  %v3148_v20 = vadd.f32 %v3147_v29, %v4005_v60  ;;  %v3151_v59 = vadd.f32 %v1393_v37, %v4033_v48 }
 0x280   : > { %1761 = vst [vmem:[#allocation2 + $0x8] sm:$0xff] %v1749_v55  ;;  %v1690_v24 = vmax.f32 %v3146_v49, 0.0  ;;  %v3150_v45 = vadd.f32 %v3149_v54, %v4007_v62 }
 0x281   : > { %1762 = vst [vmem:[#allocation2 + $0x10] sm:$0xff] %v1750_v0  ;;  %v1691_v11 = vmax.f32 %v3148_v20, 0.0  ;;  %v3152_v23 = vadd.f32 %v3151_v59, %v4009_v31  ;;  %v4103_v31 = vrot.slane %v1708_v35, %v1720_v26 }
 0x282   : > { %v1693_v5 = vmax.f32 %v3150_v45, 0.0  ;;  %v1731_v42 = vmul.f32 %v4069_v51, %v1690_v24 }
 0x283   : > { %v1694_v57 = vmax.f32 %v3152_v23, 0.0  ;;  %v1397_v25 = vpop.f32.mrb[8].mxu0  ;;  %v1732_v16 = vmul.f32 %v4077_v36, %v1691_v11 }
 0x284   : > { %v1734_v52 = vmul.f32 %v4069_v51, %v1693_v5  ;;  %v3153_v60 = vadd.f32 %v1397_v25, %v4041_v2  ;;  %v1399_v48 = vpop.f32.mrb[9].mxu0  ;;  %v3111_v4 = vpop.f32.mrb[48].mxu1 }
 0x285   : > { %v1735_v62 = vmul.f32 %v4077_v36, %v1694_v57  ;;  %v3155_v34 = vadd.f32 %v1399_v48, %v4041_v2  ;;  %v1401_v50 = vpop.f32.mrb[10].mxu0  ;;  %v1662_v6 = vadd.f32 %v3111_v4, %v4037_v28  ;;  %v1653_v22 = vpop.f32.mrb[49].mxu1 }
 0x286   : > { %v1752_v39 = vpack.c.bf16 %v1734_v52, %v1731_v42  ;;  %v3154_v8 = vadd.f32 %v3153_v60, %v4011_v61  ;;  %v3157_v30 = vadd.f32 %v1401_v50, %v4043_v33  ;;  %v1403_v9 = vpop.f32.mrb[11].mxu0  ;;  %v1654_v2 = vadd.f32 %v1653_v22, %v4027_v56  ;;  %v3112_v21 = vpop.f32.mrb[50].mxu1 }
 0x287   : > { %v1753_v41 = vpack.c.bf16 %v1735_v62, %v1732_v16  ;;  %v3156_v13 = vadd.f32 %v3155_v34, %v4013_v32  ;;  %v3159_v14 = vadd.f32 %v1403_v9, %v4043_v33  ;;  %v1692_v29 = vmax.f32 %v1662_v6, 0.0  ;;  %v1656_v28 = vpop.f32.mrb[51].mxu1 }
 0x288   : > { %1764 = vst [vmem:[#allocation2 + $0x30] sm:$0xff] %v1752_v39  ;;  %v1696_v35 = vmax.f32 %v3154_v8, 0.0  ;;  %v3158_v38 = vadd.f32 %v3157_v30, %v4015_v7  ;;  %v1665_v61 = vadd.f32 %v3112_v21, %v4039_v27  ;;  %v1686_v49 = vmax.f32 %v1654_v2, 0.0 }
 0x289   : > { %1765 = vst [vmem:[#allocation2 + $0x38] sm:$0xff] %v1753_v41  ;;  %v1697_v55 = vmax.f32 %v3156_v13, 0.0  ;;  %v3160_v54 = vadd.f32 %v3159_v14, %v4017_v58  ;;  %v1657_v32 = vadd.f32 %v1656_v28, %v4029_v46  ;;  %v1733_v0 = vmul.f32 %v4103_v31, %v1692_v29 }
 0x28a   : > { %v1699_v37 = vmax.f32 %v3158_v38, 0.0  ;;  %v1695_v56 = vmax.f32 %v1665_v61, 0.0  ;;  %v1737_v33 = vmul.f32 %v4069_v51, %v1696_v35  ;;  %v1727_v46 = vmul.f32 %v4103_v31, %v1686_v49 }
 0x28b   : > { %v1700_v20 = vmax.f32 %v3160_v54, 0.0  ;;  %v1689_v59 = vmax.f32 %v1657_v32, 0.0  ;;  %v1407_v24 = vpop.f32.mrb[12].mxu0  ;;  %v1738_v7 = vmul.f32 %v4077_v36, %v1697_v55 }
 0x28c   : > { %v1740_v27 = vmul.f32 %v4069_v51, %v1699_v37  ;;  %v1736_v45 = vmul.f32 %v4103_v31, %v1695_v56  ;;  %v3161_v11 = vadd.f32 %v1407_v24, %v4056_v19  ;;  %v1409_v58 = vpop.f32.mrb[13].mxu0  ;;  %v3115_v25 = vpop.f32.mrb[52].mxu1  ;;  %v4146_v37 = vld [vmem:[#allocation2] sm:$0xff] (!%p2939_p8) }
 0x28d   : > { %v1741_v23 = vmul.f32 %v4077_v36, %v1700_v20  ;;  %v1730_v5 = vmul.f32 %v4103_v31, %v1689_v59  ;;  %v3163_v57 = vadd.f32 %v1409_v58, %v4056_v19  ;;  %v1411_v42 = vpop.f32.mrb[14].mxu0  ;;  %v1678_v16 = vadd.f32 %v3115_v25, %v4073_v18  ;;  %v1669_v62 = vpop.f32.mrb[53].mxu1  ;;  %1813 = vrot.lane.b32.xlu1 (!%p2939_p8), %v4146_v37, %s3335_s13  ;;  %v4199_v58 = vld [vmem:[#allocation2 + $0x50] sm:$0xff] (!%p2939_p8) }
 0x28e   : > { %v1755_v52 = vpack.c.bf16 %v1740_v27, %v1737_v33  ;;  %v1754_v60 = vpack.c.bf16 %v1736_v45, %v1733_v0  ;;  %v3162_v48 = vadd.f32 %v3161_v11, %v4019_v53  ;;  %v1413_v34 = vpop.f32.mrb[15].mxu0  ;;  %v3165_v8 = vadd.f32 %v1411_v42, %v4052_v15  ;;  %v3116_v6 = vpop.f32.mrb[54].mxu1  ;;  %v4184_v11 = vld [vmem:[#allocation2 + $0x28] sm:$0xff] (!%p2939_p8) }
 0x28f   : > { %v1756_v4 = vpack.c.bf16 %v1741_v23, %v1738_v7  ;;  %v1751_v50 = vpack.c.bf16 %v1730_v5, %v1727_v46  ;;  %v3164_v39 = vadd.f32 %v3163_v57, %v4021_v63  ;;  %v1704_v30 = vmax.f32 %v1678_v16, 0.0  ;;  %v1672_v53 = vpop.f32.mrb[55].mxu1  ;;  %v4206_v46 = vld [vmem:[#allocation2 + $0x78] sm:$0xff] (!%p2939_p8) }
 0x290   : > { %1767 = vst [vmem:[#allocation2 + $0x58] sm:$0xff] %v1755_v52  ;;  %1766 = vst [vmem:[#allocation2 + $0x40] sm:$0xff] %v1754_v60  ;;  %v1702_v19 = vmax.f32 %v3162_v48, 0.0  ;;  %v1670_v22 = vadd.f32 %v1669_v62, %v4050_v47  ;;  %v3167_v9 = vadd.f32 %v1413_v34, %v4052_v15  ;;  %v3166_v18 = vadd.f32 %v3165_v8, %v4023_v1  ;;  %v4156_v56 = vld [vmem:[#allocation2 + $0x38] sm:$0xff] (!%p2939_p8) }
 0x291   : > { %1768 = vst [vmem:[#allocation2 + $0x60] sm:$0xff] %v1756_v4  ;;  %1763 = vst [vmem:[#allocation2 + $0x18] sm:$0xff] %v1751_v50  ;;  %v1681_v41 = vadd.f32 %v3116_v6, %v4080_v43  ;;  %v1673_v63 = vadd.f32 %v1672_v53, %v4054_v17  ;;  %v1703_v13 = vmax.f32 %v3164_v39, 0.0  ;;  %v1745_v15 = vmul.f32 %v4103_v31, %v1704_v30 }
 0x292   : > { %v1698_v2 = vmax.f32 %v1670_v22, 0.0  ;;  %v3168_v14 = vadd.f32 %v3167_v9, %v4025_v40  ;;  %v1705_v21 = vmax.f32 %v3166_v18, 0.0  ;;  %v1743_v47 = vmul.f32 %v4069_v51, %v1702_v19 }
 0x293   : > { %v1707_v35 = vmax.f32 %v1681_v41, 0.0  ;;  %v1701_v29 = vmax.f32 %v1673_v63, 0.0  ;;  %v1744_v28 = vmul.f32 %v4077_v36, %v1703_v13 }
 0x294   : > { %v1706_v38 = vmax.f32 %v3168_v14, 0.0  ;;  %v1746_v61 = vmul.f32 %v4069_v51, %v1705_v21  ;;  %v1739_v1 = vmul.f32 %v4103_v31, %v1698_v2  ;;  %1776 = sbr.rel (%p2939_p8) target bundleno = 1263 (0x4ef), region = 52  ;;  %v4144_v51 = vld [vmem:[#allocation2 + $0x8] sm:$0xff] (!%p2939_p8) }
 0x295   : > { %v1748_v43 = vmul.f32 %v4103_v31, %v1707_v35  ;;  %v1742_v17 = vmul.f32 %v4103_v31, %v1701_v29  ;;  %v4148_v31 = vld [vmem:[#allocation2 + $0x10] sm:$0xff] (!%p2939_p8)  ;;  %1815 = vrot.lane.b32.xlu0 (!%p2939_p8), %v4144_v51, %s3335_s13 }
 0x296   : > { %v1747_v40 = vmul.f32 %v4077_v36, %v1706_v38  ;;  %v1758_v55 = vpack.c.bf16 %v1746_v61, %v1743_v47  ;;  %v4154_v36 = vld [vmem:[#allocation2 + $0x30] sm:$0xff] (!%p2939_p8)  ;;  %2555 = vmatprep.subr.bf16.mxu1 (!%p2939_p8), %v4148_v31  ;;  %v4381_v61 = vld [vmem:[%s4723_s3] sm:$0xff] (!%p2939_p8) }
 0x297   : > { %v1760_v49 = vpack.c.bf16 %v1748_v43, %v1745_v15  ;;  %v1757_v54 = vpack.c.bf16 %v1742_v17, %v1739_v1  ;;  %v4158_v33 = vld [vmem:[#allocation2 + $0x58] sm:$0xff] (!%p2939_p8)  ;;  %2556 = vmatpush1.bf16.msra.mxu1 (!%p2939_p8), %v4144_v51  ;;  %v4170_v7 = vld [vmem:[#allocation2 + $0x40] sm:$0xff] (!%p2939_p8)  ;;  %1823 = vrot.lane.b32.xlu1 (!%p2939_p8), %v4154_v36, %s3335_s13  ;;  %v4385_v17 = vcombine.high (!%p2939_p8), %v4381_v61, %v4381_v61 }
 0x298   : > { %v1759_v32 = vpack.c.bf16 %v1747_v40, %v1744_v28  ;;  %1770 = vst [vmem:[#allocation2 + $0x80] sm:$0xff] %v1758_v55  ;;  %v4160_v0 = vld [vmem:[#allocation2 + $0x60] sm:$0xff] (!%p2939_p8)  ;;  %v4168_v24 = vld [vmem:[#allocation2 + $0x18] sm:$0xff] (!%p2939_p8)  ;;  %2557 = vmatprep.subr.bf16.mxu1 (!%p2939_p8), %v4156_v56  ;;  %2090 = vst [vmem:[#allocation3 + $0x1a8] sm:$0xff] (!%p2939_p8), %v4170_v7 }
 0x299   : > { %1772 = vst [vmem:[#allocation2 + $0x90] sm:$0xff] %v1760_v49  ;;  %1769 = vst [vmem:[#allocation2 + $0x68] sm:$0xff] %v1757_v54  ;;  %1817 = vrot.lane.b32.xlu0 (!%p2939_p8), %v4148_v31, %s3335_s13  ;;  %2546 = vmatprep.mubr.bf16.mxu0 (!%p2939_p8), %v4385_v17 }
 0x29a   : > { %1771 = vst [vmem:[#allocation2 + $0x88] sm:$0xff] %v1759_v32  ;;  %2087 = vst [vmem:[#allocation3 + $0x190] sm:$0xff] (!%p2939_p8), %v4168_v24 }
 0x29b   : > { %2558 = vmatpush1.bf16.msra.mxu1 %v4154_v36  ;;  %1821 = vrot.lane.b32.xlu1 %v4184_v11, %s3335_s13 }
 0x29c   : > { %2559 = vmatprep.subr.bf16.mxu1 %v4160_v0 }
 0x29d   : > { %1825 = vrot.lane.b32.xlu0 %v4156_v56, %s3335_s13 }
 0x29f   : > { %v4163_v20 = vld [vmem:[#allocation2 + $0x80] sm:$0xff]  ;;  %2560 = vmatpush1.bf16.msra.mxu1 %v4158_v33  ;;  %1833 = vrot.lane.b32.xlu1 %v4160_v0, %s3335_s13 }
 0x2a0   : > { %v4172_v27 = vld [vmem:[#allocation2 + $0x68] sm:$0xff]  ;;  %v4182_v45 = vld [vmem:[#allocation2 + $0x90] sm:$0xff] }
 0x2a1   : > { %v4165_v59 = vld [vmem:[#allocation2 + $0x88] sm:$0xff]  ;;  %2093 = vst [vmem:[#allocation3 + $0x1c0] sm:$0xff] %v4172_v27  ;;  %2096 = vst [vmem:[#allocation3 + $0x1d8] sm:$0xff] %v4182_v45  ;;  %1831 = vrot.lane.b32.xlu0 %v4158_v33, %s3335_s13 }
 0x2a2   : > { %2561 = vmatprep.subr.bf16.mxu1 %v4165_v59 }
 0x2a3   : > { %2562 = vmatpush1.bf16.msra.mxu1 %v4163_v20  ;;  %1839 = vrot.lane.b32.xlu1 %v4163_v20, %s3335_s13 }
 0x2a5   : > { %1829 = vrot.lane.b32.xlu0 %v4199_v58, %s3335_s13 }
 0x2a7   : > { %1837 = vrot.lane.b32.xlu1 %v4206_v46, %s3335_s13 }
 0x2a9   : > { %1841 = vrot.lane.b32.xlu0 %v4165_v59, %s3335_s13 }
 0x2ab   : > { %1885 = vrot.lane.b32.xlu1 %v4148_v31, %s3336_s23 }
 0x2ad   : > { %1883 = vrot.lane.b32.xlu0 %v4144_v51, %s3336_s23 }
 0x2af   : > { %1891 = vrot.lane.b32.xlu1 %v4154_v36, %s3336_s23 }
 0x2b1   : > { %1881 = vrot.lane.b32.xlu0 %v4146_v37, %s3336_s23 }
 0x2b3   : > { %1889 = vrot.lane.b32.xlu1 %v4184_v11, %s3336_s23 }
 0x2b5   : > { %1893 = vrot.lane.b32.xlu0 %v4156_v56, %s3336_s23 }
 0x2b7   : > { %2105 = vrot.lane.b32.xlu1 %v4168_v24, %s3337_s14 }
 0x2b9   : > { %2103 = vrot.lane.b32.xlu0 %v4148_v31, %s3337_s14 }
 0x2bb   : > { %1899 = vrot.lane.b32.xlu1 %v4158_v33, %s3336_s23 }
 0x2bd   : > { %2101 = vrot.lane.b32.xlu0 %v4144_v51, %s3337_s14 }
 0x2bf   : > { %1897 = vrot.lane.b32.xlu1 %v4199_v58, %s3336_s23 }
 0x2c1   : > { %1901 = vrot.lane.b32.xlu0 %v4160_v0, %s3336_s23 }
 0x2c3   : > { %2113 = vrot.lane.b32.xlu1 %v4170_v7, %s3337_s14 }
 0x2c5   : > { %2111 = vrot.lane.b32.xlu0 %v4156_v56, %s3337_s14 }
 0x2c7   : > { %1907 = vrot.lane.b32.xlu1 %v4163_v20, %s3336_s23 }
 0x2c9   : > { %2109 = vrot.lane.b32.xlu0 %v4154_v36, %s3337_s14 }
 0x2cb   : > { %1905 = vrot.lane.b32.xlu1 %v4206_v46, %s3336_s23 }
 0x2cd   : > { %1909 = vrot.lane.b32.xlu0 %v4165_v59, %s3336_s23 }
 0x2cf   : > { %2121 = vrot.lane.b32.xlu1 %v4172_v27, %s3337_s14 }
 0x2d1   : > { %2119 = vrot.lane.b32.xlu0 %v4160_v0, %s3337_s14 }
 0x2d3   : > { %1951 = vrot.lane.b32.xlu1 %v4144_v51, %s3338_s15 }
 0x2d5   : > { %2117 = vrot.lane.b32.xlu0 %v4158_v33, %s3337_s14 }
 0x2d7   : > { %1949 = vrot.lane.b32.xlu1 %v4146_v37, %s3338_s15 }
 0x2d9   : > { %1953 = vrot.lane.b32.xlu0 %v4148_v31, %s3338_s15 }
 0x2db   : > { %2129 = vrot.lane.b32.xlu1 %v4182_v45, %s3337_s14 }
 0x2dd   : > { %2127 = vrot.lane.b32.xlu0 %v4165_v59, %s3337_s14 }
 0x2df   : > { %1959 = vrot.lane.b32.xlu1 %v4154_v36, %s3338_s15 }
 0x2e1   : > { %2125 = vrot.lane.b32.xlu0 %v4163_v20, %s3337_s14 }
 0x2e3   : > { %1957 = vrot.lane.b32.xlu1 %v4184_v11, %s3338_s15 }
 0x2e5   : > { %1961 = vrot.lane.b32.xlu0 %v4156_v56, %s3338_s15 }
 0x2e7   : > { %2173 = vrot.lane.b32.xlu1 %v4168_v24, %s3339_s16 }
 0x2e9   : > { %2171 = vrot.lane.b32.xlu0 %v4148_v31, %s3339_s16 }
 0x2eb   : > { %1967 = vrot.lane.b32.xlu1 %v4158_v33, %s3338_s15 }
 0x2ed   : > { %2169 = vrot.lane.b32.xlu0 %v4144_v51, %s3339_s16 }
 0x2ef   : > { %1965 = vrot.lane.b32.xlu1 %v4199_v58, %s3338_s15 }
 0x2f1   : > { %1969 = vrot.lane.b32.xlu0 %v4160_v0, %s3338_s15 }
 0x2f3   : > { %2181 = vrot.lane.b32.xlu1 %v4170_v7, %s3339_s16 }
 0x2f5   : > { %2179 = vrot.lane.b32.xlu0 %v4156_v56, %s3339_s16 }
 0x2f7   : > { %1975 = vrot.lane.b32.xlu1 %v4163_v20, %s3338_s15 }
 0x2f9   : > { %2177 = vrot.lane.b32.xlu0 %v4154_v36, %s3339_s16 }
 0x2fb   : > { %1973 = vrot.lane.b32.xlu1 %v4206_v46, %s3338_s15 }
 0x2fd   : > { %1977 = vrot.lane.b32.xlu0 %v4165_v59, %s3338_s15 }
 0x2ff   : > { %2189 = vrot.lane.b32.xlu1 %v4172_v27, %s3339_s16  ;;  %v1814_v5 = vpop.permute.xlu1 %1813 }
 0x301   : > { %2187 = vrot.lane.b32.xlu0 %v4160_v0, %s3339_s16 }
 0x303   : > { %2019 = vrot.lane.b32.xlu1 %v4144_v51, %s3340_s17 }
 0x305   : > { %2185 = vrot.lane.b32.xlu0 %v4158_v33, %s3339_s16 }
 0x307   : > { %v1816_v23 = vpop.permute.xlu0 %1815  ;;  %2017 = vrot.lane.b32.xlu1 %v4146_v37, %s3340_s17 }
 0x308   : > { %v1845_v57 = vsel %vm438_vm3, %v1814_v5, %v1816_v23 }
 0x309   : > { %2021 = vrot.lane.b32.xlu0 %v4148_v31, %s3340_s17  ;;  %v1824_v42 = vpop.permute.xlu1 %1823 }
 0x30b   : > { %v4309_v25 = vpop.permute.xlu0 %1817  ;;  %2197 = vrot.lane.b32.xlu1 %v4182_v45, %s3339_s16 }
 0x30c   : > { %v1846_v52 = vsel %vm438_vm3, %v1816_v23, %v4309_v25 }
 0x30d   : > { %2195 = vrot.lane.b32.xlu0 %v4165_v59, %s3339_s16  ;;  %2514 = vmatprep.subr.bf16.mxu0 %v1846_v52  ;;  %v1822_v48 = vpop.permute.xlu1 %1821 }
 0x30e   : > { %2515 = vmatpush1.bf16.msra.mxu0 %v1845_v57  ;;  %v1848_v62 = vsel %vm438_vm3, %v1822_v48, %v1824_v42 }
 0x30f   : > { %v4317_v60 = vpop.permute.xlu0 %1825  ;;  %2027 = vrot.lane.b32.xlu1 %v4154_v36, %s3340_s17 }
 0x310   : > { %v1849_v16 = vsel %vm438_vm3, %v1824_v42, %v4317_v60 }
 0x311   : > { %2193 = vrot.lane.b32.xlu0 %v4163_v20, %s3339_s16  ;;  %2516 = vmatprep.subr.bf16.mxu0 %v1849_v16  ;;  %v4326_v4 = vpop.permute.xlu1 %1833 }
 0x312   : > { %2517 = vmatpush1.bf16.msra.mxu0 %v1848_v62 }
 0x313   : > { %v1832_v34 = vpop.permute.xlu0 %1831  ;;  %2025 = vrot.lane.b32.xlu1 %v4184_v11, %s3340_s17 }
 0x314   : > { %v1852_v50 = vsel %vm438_vm3, %v1832_v34, %v4326_v4 }
 0x315   : > { %2029 = vrot.lane.b32.xlu0 %v4156_v56, %s3340_s17  ;;  %2518 = vmatprep.subr.bf16.mxu0 %v1852_v50  ;;  %v1840_v8 = vpop.permute.xlu1 %1839 }
 0x317   : > { %v1830_v39 = vpop.permute.xlu0 %1829  ;;  %2241 = vrot.lane.b32.xlu1 %v4168_v24, %s3341_s18 }
 0x318   : > { %v1851_v6 = vsel %vm438_vm3, %v1830_v39, %v1832_v34 }
 0x319   : > { %2239 = vrot.lane.b32.xlu0 %v4148_v31, %s3341_s18  ;;  %2519 = vmatpush1.bf16.msra.mxu0 %v1851_v6  ;;  %v1838_v30 = vpop.permute.xlu1 %1837 }
 0x31a   : > { %v1854_v9 = vsel %vm438_vm3, %v1838_v30, %v1840_v8 }
 0x31b   : > { %v4339_v19 = vpop.permute.xlu0 %1841  ;;  %2035 = vrot.lane.b32.xlu1 %v4158_v33, %s3340_s17 }
 0x31c   : > { %v1855_v22 = vsel %vm438_vm3, %v1840_v8, %v4339_v19 }
 0x31d   : > { %2237 = vrot.lane.b32.xlu0 %v4144_v51, %s3341_s18  ;;  %2520 = vmatprep.subr.bf16.mxu0 %v1855_v22  ;;  %v4348_v18 = vpop.permute.xlu1 %1885 }
 0x31e   : > { %2521 = vmatpush1.bf16.msra.mxu0 %v1854_v9 }
 0x31f   : > { %v1884_v53 = vpop.permute.xlu0 %1883  ;;  %2033 = vrot.lane.b32.xlu1 %v4199_v58, %s3340_s17  ;;  %v4413_v58 = vld [vmem:[%s4723_s3 + $0x8] sm:$0xff] }
 0x320   : > { %v1914_v41 = vsel %vm507_vm4, %v1884_v53, %v4348_v18  ;;  %v4417_v23 = vcombine.high %v4413_v58, %v4413_v58 }
 0x321   : > { %2037 = vrot.lane.b32.xlu0 %v4160_v0, %s3340_s17  ;;  %2522 = vmatprep.subr.bf16.mxu0 %v1914_v41  ;;  %v1892_v13 = vpop.permute.xlu1 %1891 }
 0x322   : > { %2587 = vmatprep.mubr.bf16.mxu1 %v4417_v23 }
 0x323   : > { %v1882_v63 = vpop.permute.xlu0 %1881  ;;  %2249 = vrot.lane.b32.xlu1 %v4170_v7, %s3341_s18 }
 0x324   : > { %v1913_v2 = vsel %vm507_vm4, %v1882_v63, %v1884_v53 }
 0x325   : > { %2247 = vrot.lane.b32.xlu0 %v4156_v56, %s3341_s18  ;;  %2523 = vmatpush1.bf16.msra.mxu0 %v1913_v2  ;;  %v1890_v21 = vpop.permute.xlu1 %1889 }
 0x326   : > { %v1916_v29 = vsel %vm507_vm4, %v1890_v21, %v1892_v13 }
 0x327   : > { %v4361_v14 = vpop.permute.xlu0 %1893  ;;  %2043 = vrot.lane.b32.xlu1 %v4163_v20, %s3340_s17 }
 0x328   : > { %v1917_v35 = vsel %vm507_vm4, %v1892_v13, %v4361_v14 }
 0x329   : > { %2245 = vrot.lane.b32.xlu0 %v4154_v36, %s3341_s18  ;;  %2524 = vmatprep.subr.bf16.mxu0 %v1917_v35  ;;  %v4370_v15 = vpop.permute.xlu1 %2105 }
 0x32a   : > { %2525 = vmatpush1.bf16.msra.mxu0 %v1916_v29 }
 0x32b   : > { %v2104_v47 = vpop.permute.xlu0 %2103  ;;  %2041 = vrot.lane.b32.xlu1 %v4206_v46, %s3340_s17 }
 0x32c   : > { %v2134_v38 = vsel %vm730_vm8, %v2104_v47, %v4370_v15 }
 0x32d   : > { %2045 = vrot.lane.b32.xlu0 %v4165_v59, %s3340_s17  ;;  %2563 = vmatprep.subr.bf16.mxu1 %v2134_v38  ;;  %v1900_v43 = vpop.permute.xlu1 %1899 }
 0x32f   : > { %v2102_v1 = vpop.permute.xlu0 %2101  ;;  %2257 = vrot.lane.b32.xlu1 %v4172_v27, %s3341_s18 }
 0x330   : > { %v2133_v28 = vsel %vm730_vm8, %v2102_v1, %v2104_v47 }
 0x331   : > { %2255 = vrot.lane.b32.xlu0 %v4160_v0, %s3341_s18  ;;  %2564 = vmatpush1.bf16.msra.mxu1 %v2133_v28  ;;  %v1898_v55 = vpop.permute.xlu1 %1897 }
 0x332   : > { %v1919_v54 = vsel %vm507_vm4, %v1898_v55, %v1900_v43  ;;  %v3343_v55 = vmov 0  }
 0x333   : > { %v4393_v40 = vpop.permute.xlu0 %1901  ;;  %2307 = vrot.lane.b32.xlu1 %v4148_v31, %s3342_s22  ;;  %3279 = vset.pattern.permute.xlu0 %v3343_v55 }
 0x334   : > { %v1920_v49 = vsel %vm507_vm4, %v1900_v43, %v4393_v40 }
 0x335   : > { %2253 = vrot.lane.b32.xlu0 %v4158_v33, %s3341_s18  ;;  %2526 = vmatprep.subr.bf16.mxu0 %v1920_v49  ;;  %v4402_v37 = vpop.permute.xlu1 %2113 }
 0x336   : > { %2527 = vmatpush1.bf16.msra.mxu0 %v1919_v54 }
 0x337   : > { %v2112_v32 = vpop.permute.xlu0 %2111  ;;  %2263 = vrot.lane.b32.xlu1 %v4165_v59, %s3341_s18 }
 0x338   : > { %v2137_v11 = vsel %vm730_vm8, %v2112_v32, %v4402_v37 }
 0x339   : > { %2309 = vrot.lane.b32.xlu0 %v4168_v24, %s3342_s22  ;;  %2565 = vmatprep.subr.bf16.mxu1 %v2137_v11  ;;  %v1908_v46 = vpop.permute.xlu1 %1907 }
 0x33b   : > { %v2110_v31 = vpop.permute.xlu0 %2109  ;;  %2305 = vrot.lane.b32.xlu1 %v4144_v51, %s3342_s22 }
 0x33c   : > { %v2136_v5 = vsel %vm730_vm8, %v2110_v31, %v2112_v32 }
 0x33d   : > { %2265 = vrot.lane.b32.xlu0 %v4182_v45, %s3341_s18  ;;  %2566 = vmatpush1.bf16.msra.mxu1 %v2136_v5  ;;  %v1906_v42 = vpop.permute.xlu1 %1905 }
 0x33e   : > { %v1922_v48 = vsel %vm507_vm4, %v1906_v42, %v1908_v46 }
 0x33f   : > { %v4425_v57 = vpop.permute.xlu0 %1909  ;;  %2315 = vrot.lane.b32.xlu1 %v4156_v56, %s3342_s22 }
 0x340   : > { %v1923_v52 = vsel %vm507_vm4, %v1908_v46, %v4425_v57 }
 0x341   : > { %2261 = vrot.lane.b32.xlu0 %v4163_v20, %s3341_s18  ;;  %2528 = vmatprep.subr.bf16.mxu0 %v1923_v52  ;;  %v4434_v51 = vpop.permute.xlu1 %2121 }
 0x342   : > { %2529 = vmatpush1.bf16.msra.mxu0 %v1922_v48  ;;  %v1786_v48 = vld [vmem:[#allocation2 + $0x48] sm:$0xff] }
 0x343   : > { %v2120_v16 = vpop.permute.xlu0 %2119  ;;  %1955 = vrot.lane.b32.xlu1 %v4168_v24, %s3338_s15 }
 0x344   : > { %v2140_v62 = vsel %vm730_vm8, %v2120_v16, %v4434_v51 }
 0x345   : > { %2317 = vrot.lane.b32.xlu0 %v4170_v7, %s3342_s22  ;;  %2567 = vmatprep.subr.bf16.mxu1 %v2140_v62  ;;  %v1952_v50 = vpop.permute.xlu1 %1951 }
 0x347   : > { %v2118_v34 = vpop.permute.xlu0 %2117  ;;  %1819 = vrot.lane.b32.xlu1 %v4168_v24, %s3335_s13 }
 0x348   : > { %v2139_v39 = vsel %vm730_vm8, %v2118_v34, %v2120_v16  ;;  %v1791_v34 = vld [vmem:[#allocation2 + $0x70] sm:$0xff] }
 0x349   : > { %2313 = vrot.lane.b32.xlu0 %v4154_v36, %s3342_s22  ;;  %2568 = vmatpush1.bf16.msra.mxu1 %v2139_v39  ;;  %v1950_v8 = vpop.permute.xlu1 %1949 }
 0x34a   : > { %v1981_v30 = vsel %vm576_vm6, %v1950_v8, %v1952_v50 }
 0x34b   : > { %v4447_v56 = vpop.permute.xlu0 %1953  ;;  %2325 = vrot.lane.b32.xlu1 %v4172_v27, %s3342_s22 }
 0x34c   : > { %v1982_v6 = vsel %vm576_vm6, %v1952_v50, %v4447_v56 }
 0x34d   : > { %2323 = vrot.lane.b32.xlu0 %v4160_v0, %s3342_s22  ;;  %2530 = vmatprep.subr.bf16.mxu0 %v1982_v6  ;;  %v4456_v22 = vpop.permute.xlu1 %2129  ;;  %v1796_v6 = vld [vmem:[#allocation2 + $0x98] sm:$0xff] }
 0x34e   : > { %2531 = vmatpush1.bf16.msra.mxu0 %v1981_v30 }
 0x34f   : > { %v2128_v36 = vpop.permute.xlu0 %2127  ;;  %2321 = vrot.lane.b32.xlu1 %v4158_v33, %s3342_s22 }
 0x350   : > { %v2143_v9 = vsel %vm730_vm8, %v2128_v36, %v4456_v22 }
 0x351   : > { %1963 = vrot.lane.b32.xlu0 %v4170_v7, %s3338_s15  ;;  %2569 = vmatprep.subr.bf16.mxu1 %v2143_v9  ;;  %v1960_v0 = vpop.permute.xlu1 %1959 }
 0x353   : > { %v2126_v53 = vpop.permute.xlu0 %2125  ;;  %2331 = vrot.lane.b32.xlu1 %v4165_v59, %s3342_s22 }
 0x354   : > { %v2142_v41 = vsel %vm730_vm8, %v2126_v53, %v2128_v36 }
 0x355   : > { %1827 = vrot.lane.b32.xlu0 %v4170_v7, %s3335_s13  ;;  %2570 = vmatpush1.bf16.msra.mxu1 %v2142_v41  ;;  %v1958_v13 = vpop.permute.xlu1 %1957 }
 0x356   : > { %v1984_v33 = vsel %vm576_vm6, %v1958_v13, %v1960_v0 }
 0x357   : > { %v4469_v63 = vpop.permute.xlu0 %1961  ;;  %1971 = vrot.lane.b32.xlu1 %v4172_v27, %s3338_s15 }
 0x358   : > { %v1985_v2 = vsel %vm576_vm6, %v1960_v0, %v4469_v63 }
 0x359   : > { %2333 = vrot.lane.b32.xlu0 %v4182_v45, %s3342_s22  ;;  %2532 = vmatprep.subr.bf16.mxu0 %v1985_v2  ;;  %v4478_v35 = vpop.permute.xlu1 %2173 }
 0x35a   : > { %2533 = vmatpush1.bf16.msra.mxu0 %v1984_v33 }
 0x35b   : > { %v2172_v21 = vpop.permute.xlu0 %2171  ;;  %1835 = vrot.lane.b32.xlu1 %v4172_v27, %s3335_s13 }
 0x35c   : > { %v2202_v59 = vsel %vm799_vm9, %v2172_v21, %v4478_v35 }
 0x35d   : > { %2329 = vrot.lane.b32.xlu0 %v4163_v20, %s3342_s22  ;;  %2571 = vmatprep.subr.bf16.mxu1 %v2202_v59  ;;  %v1968_v47 = vpop.permute.xlu1 %1967 }
 0x35f   : > { %v2170_v29 = vpop.permute.xlu0 %2169  ;;  %1843 = vrot.lane.b32.xlu1 %v4182_v45, %s3335_s13 }
 0x360   : > { %v2201_v38 = vsel %vm799_vm9, %v2170_v29, %v2172_v21 }
 0x361   : > { %1979 = vrot.lane.b32.xlu0 %v4182_v45, %s3338_s15  ;;  %2572 = vmatpush1.bf16.msra.mxu1 %v2201_v38  ;;  %v1966_v43 = vpop.permute.xlu1 %1965 }
 0x362   : > { %v1987_v28 = vsel %vm576_vm6, %v1966_v43, %v1968_v47 }
 0x363   : > { %v4491_v1 = vpop.permute.xlu0 %1969  ;;  %1887 = vrot.lane.b32.xlu1 %v4168_v24, %s3336_s23 }
 0x364   : > { %v1988_v20 = vsel %vm576_vm6, %v1968_v47, %v4491_v1 }
 0x365   : > { %2023 = vrot.lane.b32.xlu0 %v4168_v24, %s3340_s17  ;;  %2534 = vmatprep.subr.bf16.mxu0 %v1988_v20  ;;  %v4501_v54 = vpop.permute.xlu1 %2181  ;;  %v1781_v24 = vld [vmem:[#allocation2 + $0x20] sm:$0xff] }
 0x366   : > { %2535 = vmatpush1.bf16.msra.mxu0 %v1987_v28 }
 0x367   : > { %v2180_v49 = vpop.permute.xlu0 %2179  ;;  %1895 = vrot.lane.b32.xlu1 %v4170_v7, %s3336_s23 }
 0x368   : > { %v2205_v32 = vsel %vm799_vm9, %v2180_v49, %v4501_v54 }
 0x369   : > { %2031 = vrot.lane.b32.xlu0 %v4170_v7, %s3340_s17  ;;  %2573 = vmatprep.subr.bf16.mxu1 %v2205_v32  ;;  %v1976_v31 = vpop.permute.xlu1 %1975 }
 0x36b   : > { %v2178_v11 = vpop.permute.xlu0 %2177  ;;  %1903 = vrot.lane.b32.xlu1 %v4172_v27, %s3336_s23 }
 0x36c   : > { %v2204_v46 = vsel %vm799_vm9, %v2178_v11, %v2180_v49  ;;  %v2757_v11 = vld [vmem:[#allocation4] sm:$0x1] }
 0x36d   : > { %2039 = vrot.lane.b32.xlu0 %v4172_v27, %s3340_s17  ;;  %2574 = vmatpush1.bf16.msra.mxu1 %v2204_v46  ;;  %v1974_v42 = vpop.permute.xlu1 %1973 }
 0x36e   : > { %v1990_v7 = vsel %vm576_vm6, %v1974_v42, %v1976_v31 }
 0x36f   : > { %v4514_v5 = vpop.permute.xlu0 %1977  ;;  %2047 = vrot.lane.b32.xlu1 %v4182_v45, %s3340_s17 }
 0x370   : > { %v1991_v52 = vsel %vm576_vm6, %v1976_v31, %v4514_v5 }
 0x371   : > { %2175 = vrot.lane.b32.xlu0 %v1781_v24, %s3339_s16  ;;  %2536 = vmatprep.subr.bf16.mxu0 %v1991_v52  ;;  %v4522_v62 = vpop.permute.xlu1 %2189 }
 0x372   : > { %2537 = vmatpush1.bf16.msra.mxu0 %v1990_v7 }
 0x373   : > { %v2188_v16 = vpop.permute.xlu0 %2187  ;;  %2183 = vrot.lane.b32.xlu1 %v1786_v48, %s3339_s16 }
 0x374   : > { %v2208_v27 = vsel %vm799_vm9, %v2188_v16, %v4522_v62 }
 0x375   : > { %1911 = vrot.lane.b32.xlu0 %v4182_v45, %s3336_s23  ;;  %2575 = vmatprep.subr.bf16.mxu1 %v2208_v27  ;;  %v2020_v39 = vpop.permute.xlu1 %2019 }
 0x377   : > { %v2186_v50 = vpop.permute.xlu0 %2185  ;;  %2191 = vrot.lane.b32.xlu1 %v1791_v34, %s3339_s16 }
 0x378   : > { %v2207_v8 = vsel %vm799_vm9, %v2186_v50, %v2188_v16 }
 0x379   : > { %2311 = vrot.lane.b32.xlu0 %v1781_v24, %s3342_s22  ;;  %2576 = vmatpush1.bf16.msra.mxu1 %v2207_v8  ;;  %v2018_v36 = vpop.permute.xlu1 %2017 }
 0x37a   : > { %v2049_v9 = vsel %vm645_vm7, %v2018_v36, %v2020_v39  ;;  %v4581_v36 = vcombine.low %v4381_v61, %v4381_v61 }
 0x37b   : > { %v4532_v30 = vpop.permute.xlu0 %2021  ;;  %2199 = vrot.lane.b32.xlu1 %v1796_v6, %s3339_s16 }
 0x37c   : > { %v2050_v45 = vsel %vm645_vm7, %v2020_v39, %v4532_v30 }
 0x37d   : > { %2319 = vrot.lane.b32.xlu0 %v1786_v48, %s3342_s22  ;;  %2538 = vmatprep.subr.bf16.mxu0 %v2050_v45  ;;  %v4539_v0 = vpop.permute.xlu1 %2197 }
 0x37e   : > { %2539 = vmatpush1.bf16.msra.mxu0 %v2049_v9 }
 0x37f   : > { %v2196_v53 = vpop.permute.xlu0 %2195  ;;  %2243 = vrot.lane.b32.xlu1 %v1781_v24, %s3341_s18 }
 0x380   : > { %v2211_v41 = vsel %vm799_vm9, %v2196_v53, %v4539_v0 }
 0x381   : > { %2327 = vrot.lane.b32.xlu0 %v1791_v34, %s3342_s22  ;;  %2577 = vmatprep.subr.bf16.mxu1 %v2211_v41  ;;  %v2028_v2 = vpop.permute.xlu1 %2027 }
 0x383   : > { %v2194_v13 = vpop.permute.xlu0 %2193  ;;  %2335 = vrot.lane.b32.xlu1 %v1796_v6, %s3342_s22 }
 0x384   : > { %v2210_v33 = vsel %vm799_vm9, %v2194_v13, %v2196_v53 }
 0x385   : > { %2107 = vrot.lane.b32.xlu0 %v1781_v24, %s3337_s14  ;;  %2578 = vmatpush1.bf16.msra.mxu1 %v2210_v33  ;;  %v2026_v59 = vpop.permute.xlu1 %2025 }
 0x386   : > { %v2052_v47 = vsel %vm645_vm7, %v2026_v59, %v2028_v2 }
 0x387   : > { %v4548_v21 = vpop.permute.xlu0 %2029  ;;  %2115 = vrot.lane.b32.xlu1 %v1786_v48, %s3337_s14 }
 0x388   : > { %v2053_v29 = vsel %vm645_vm7, %v2028_v2, %v4548_v21 }
 0x389   : > { %2251 = vrot.lane.b32.xlu0 %v1786_v48, %s3341_s18  ;;  %2540 = vmatprep.subr.bf16.mxu0 %v2053_v29  ;;  %v4555_v43 = vpop.permute.xlu1 %2241 }
 0x38a   : > { %2541 = vmatpush1.bf16.msra.mxu0 %v2052_v47 }
 0x38b   : > { %v2240_v38 = vpop.permute.xlu0 %2239  ;;  %2123 = vrot.lane.b32.xlu1 %v1791_v34, %s3337_s14 }
 0x38c   : > { %v2270_v20 = vsel %vm868_vm10, %v2240_v38, %v4555_v43 }
 0x38d   : > { %2259 = vrot.lane.b32.xlu0 %v1791_v34, %s3341_s18  ;;  %2579 = vmatprep.subr.bf16.mxu1 %v2270_v20  ;;  %v2036_v49 = vpop.permute.xlu1 %2035 }
 0x38f   : > { %v2238_v28 = vpop.permute.xlu0 %2237  ;;  %2131 = vrot.lane.b32.xlu1 %v1796_v6, %s3337_s14 }
 0x390   : > { %v2269_v32 = vsel %vm868_vm10, %v2238_v28, %v2240_v38 }
 0x391   : > { %2267 = vrot.lane.b32.xlu0 %v1796_v6, %s3341_s18  ;;  %2580 = vmatpush1.bf16.msra.mxu1 %v2269_v32  ;;  %v2034_v46 = vpop.permute.xlu1 %2033  ;;  %v4602_v32 = vcombine.low %v4413_v58, %v4413_v58 }
 0x392   : > { %v2055_v42 = vsel %vm645_vm7, %v2034_v46, %v2036_v49 }
 0x393   : > { %v4564_v31 = vpop.permute.xlu0 %2037 }
 0x394   : > { %v2056_v24 = vsel %vm645_vm7, %v2036_v49, %v4564_v31 }
 0x395   : > { %2542 = vmatprep.subr.bf16.mxu0 %v2056_v24  ;;  %2760 = vperm.xlu0 %3279, %v2757_v11   ;;  %v4569_v7 = vpop.permute.xlu1 %2249 }
 0x396   : > { %2543 = vmatpush1.bf16.msra.mxu0 %v2055_v42 }
 0x397   : > { %v2248_v52 = vpop.permute.xlu0 %2247 }
 0x398   : > { %v2273_v48 = vsel %vm868_vm10, %v2248_v52, %v4569_v7 }
 0x399   : > { %2581 = vmatprep.subr.bf16.mxu1 %v2273_v48  ;;  %v2044_v27 = vpop.permute.xlu1 %2043 }
 0x39b   : > { %v2246_v16 = vpop.permute.xlu0 %2245 }
 0x39c   : > { %v2272_v34 = vsel %vm868_vm10, %v2246_v16, %v2248_v52 }
 0x39d   : > { %2582 = vmatpush1.bf16.msra.mxu1 %v2272_v34  ;;  %v2042_v39 = vpop.permute.xlu1 %2041 }
 0x39e   : > { %v2058_v6 = vsel %vm645_vm7, %v2042_v39, %v2044_v27 }
 0x39f   : > { %v4574_v50 = vpop.permute.xlu0 %2045 }
 0x3a0   : > { %v2059_v8 = vsel %vm645_vm7, %v2044_v27, %v4574_v50 }
 0x3a1   : > { %2544 = vmatprep.subr.bf16.mxu0 %v2059_v8  ;;  %v4583_v9 = vpop.permute.xlu1 %2257 }
 0x3a2   : > { %2545 = vmatpush1.bf16.msra.mxu0 %v2058_v6 }
 0x3a3   : > { %v2256_v45 = vpop.permute.xlu0 %2255 }
 0x3a4   : > { %v2276_v53 = vsel %vm868_vm10, %v2256_v45, %v4583_v9 }
 0x3a5   : > { %2583 = vmatprep.subr.bf16.mxu1 %v2276_v53  ;;  %2547 = vmatmul.mubr.bf16.vlgmr.msra.gmra.mrb[0].mxu0 %v4581_v36  ;;  %v2308_v13 = vpop.permute.xlu1 %2307 }
 0x3a6   : > { %2628 = vmatprep.mubr.bf16.mxu0 %v3343_v55 }
 0x3a7   : > { %v2254_v41 = vpop.permute.xlu0 %2253 }
 0x3a8   : > { %v2275_v2 = vsel %vm868_vm10, %v2254_v41, %v2256_v45 }
 0x3a9   : > { %2584 = vmatpush1.bf16.msra.mxu1 %v2275_v2  ;;  %v2264_v61 = vpop.permute.xlu1 %2263 }
 0x3ab   : > { %v4590_v33 = vpop.permute.xlu0 %2309 }
 0x3ac   : > { %v2338_v59 = vsel %vm937_vm5, %v2308_v13, %v4590_v33 }
 0x3ad   : > { %2596 = vmatprep.subr.bf16.mxu0 %v2338_v59  ;;  %v2306_v47 = vpop.permute.xlu1 %2305 }
 0x3ae   : > { %v2337_v55 = vsel %vm937_vm5, %v2306_v47, %v2308_v13  ;;  %v2485_v47 = vld [vmem:[#allocation3 + $0x368] sm:$0xff] }
 0x3af   : > { %v4594_v29 = vpop.permute.xlu0 %2265  ;;  %2597 = vmatpush1.bf16.msra.mxu0 %v2337_v55  ;;  %v2484_v55 = vld [vmem:[#allocation3 + $0x360] sm:$0xff] }
 0x3b0   : > { %v2279_v38 = vsel %vm868_vm10, %v2264_v61, %v4594_v29 }
 0x3b1   : > { %2585 = vmatprep.subr.bf16.mxu1 %v2279_v38  ;;  %v2316_v28 = vpop.permute.xlu1 %2315 }
 0x3b3   : > { %v2262_v20 = vpop.permute.xlu0 %2261 }
 0x3b4   : > { %v2278_v49 = vsel %vm868_vm10, %v2262_v20, %v2264_v61 }
 0x3b5   : > { %2586 = vmatpush1.bf16.msra.mxu1 %v2278_v49  ;;  %v1956_v46 = vpop.permute.xlu1 %1955  ;;  %v2488_v49 = vld [vmem:[#allocation3 + $0x380] sm:$0xff] }
 0x3b6   : > { %v1983_v42 = vsel %vm576_vm6, %v4447_v56, %v1956_v46 }
 0x3b7   : > { %v4604_v11 = vpop.permute.xlu0 %2317  ;;  %3040 = vmatprep.subr.bf16.mxu1 %v1983_v42 }
 0x3b8   : > { %v2341_v24 = vsel %vm937_vm5, %v2316_v28, %v4604_v11  ;;  %2588 = vmatmul.mubr.bf16.vlgmr.msra.gmra.mrb[0].mxu1 %v4602_v32 }
 0x3b9   : > { %2598 = vmatprep.subr.bf16.mxu0 %v2341_v24  ;;  %2669 = vmatprep.mubr.bf16.mxu1 %v4385_v17  ;;  %v1820_v48 = vpop.permute.xlu1 %1819  ;;  %v2487_v24 = vld [vmem:[#allocation3 + $0x378] sm:$0xff] }
 0x3ba   : > { %v1847_v16 = vsel %vm438_vm3, %v4309_v25, %v1820_v48 }
 0x3bb   : > { %v2314_v52 = vpop.permute.xlu0 %2313  ;;  %3041 = vmatpush3.bf16.msra.mxu1 %v1847_v16 }
 0x3bc   : > { %v2340_v58 = vsel %vm937_vm5, %v2314_v52, %v2316_v28  ;;  %v2491_v52 = vld [vmem:[#allocation3 + $0x398] sm:$0xff] }
 0x3bd   : > { %2599 = vmatpush1.bf16.msra.mxu0 %v2340_v58  ;;  %v4615_v34 = vpop.permute.xlu1 %2325 }
 0x3bf   : > { %v2324_v27 = vpop.permute.xlu0 %2323 }
 0x3c0   : > { %v2344_v56 = vsel %vm937_vm5, %v2324_v27, %v4615_v34 }
 0x3c1   : > { %2600 = vmatprep.subr.bf16.mxu0 %v2344_v56  ;;  %v2322_v8 = vpop.permute.xlu1 %2321 }
 0x3c2   : > { %v2343_v6 = vsel %vm937_vm5, %v2322_v8, %v2324_v27  ;;  %v2494_v27 = vld [vmem:[#allocation3 + $0x3b0] sm:$0xff] }
 0x3c3   : > { %v1964_v39 = vpop.permute.xlu0 %1963  ;;  %2601 = vmatpush1.bf16.msra.mxu0 %v2343_v6 }
 0x3c4   : > { %v1986_v17 = vsel %vm576_vm6, %v4469_v63, %v1964_v39 }
 0x3c5   : > { %3042 = vmatprep.subr.bf16.mxu1 %v1986_v17  ;;  %v2332_v25 = vpop.permute.xlu1 %2331 }
 0x3c7   : > { %v1828_v45 = vpop.permute.xlu0 %1827 }
 0x3c8   : > { %v1850_v53 = vsel %vm438_vm3, %v4317_v60, %v1828_v45 }
 0x3c9   : > { %3043 = vmatpush3.bf16.msra.mxu1 %v1850_v53  ;;  %v1972_v13 = vpop.permute.xlu1 %1971 }
 0x3ca   : > { %v1989_v61 = vsel %vm576_vm6, %v4491_v1, %v1972_v13 }
 0x3cb   : > { %v4624_v41 = vpop.permute.xlu0 %2333  ;;  %3044 = vmatprep.subr.bf16.mxu1 %v1989_v61 }
 0x3cc   : > { %v2347_v2 = vsel %vm937_vm5, %v2332_v25, %v4624_v41 }
 0x3cd   : > { %2602 = vmatprep.subr.bf16.mxu0 %v2347_v2  ;;  %v1836_v59 = vpop.permute.xlu1 %1835  ;;  %v2429_v2 = vld [vmem:[#allocation3 + $0x1a8] sm:$0xff] }
 0x3ce   : > { %v1853_v60 = vsel %vm438_vm3, %v4326_v4, %v1836_v59 }
 0x3cf   : > { %v2330_v63 = vpop.permute.xlu0 %2329  ;;  %3045 = vmatpush3.bf16.msra.mxu1 %v1853_v60  ;;  %v2435_v60 = vld [vmem:[#allocation3 + $0x1d8] sm:$0xff] }
 0x3d0   : > { %v2346_v38 = vsel %vm937_vm5, %v2330_v63, %v2332_v25  ;;  %v2426_v25 = vld [vmem:[#allocation3 + $0x190] sm:$0xff] }
 0x3d1   : > { %2603 = vmatpush1.bf16.msra.mxu0 %v2346_v38  ;;  %v1844_v28 = vpop.permute.xlu1 %1843 }
 0x3d2   : > { %2604 = vmatprep.subr.bf16.mxu0 %v2485_v47  ;;  %v1856_v46 = vsel %vm438_vm3, %v4339_v19, %v1844_v28  ;;  %v2432_v47 = vld [vmem:[#allocation3 + $0x1c0] sm:$0xff] }
 0x3d3   : > { %v1980_v20 = vpop.permute.xlu0 %1979 }
 0x3d4   : > { %v1992_v1 = vsel %vm576_vm6, %v4514_v5, %v1980_v20  ;;  %v2490_v5 = vld [vmem:[#allocation3 + $0x390] sm:$0xff] }
 0x3d5   : > { %2605 = vmatpush1.bf16.msra.mxu0 %v2484_v55  ;;  %3046 = vmatprep.subr.bf16.mxu1 %v1992_v1  ;;  %v1888_v4 = vpop.permute.xlu1 %1887 }
 0x3d6   : > { %3047 = vmatpush3.bf16.msra.mxu1 %v1856_v46  ;;  %2606 = vmatprep.subr.bf16.mxu0 %v2488_v49  ;;  %v1915_v58 = vsel %vm507_vm4, %v4348_v18, %v1888_v4  ;;  %v2486_v46 = vld [vmem:[#allocation3 + $0x370] sm:$0xff] }
 0x3d7   : > { %v2024_v42 = vpop.permute.xlu0 %2023 }
 0x3d8   : > { %v2051_v48 = vsel %vm645_vm7, %v4532_v30, %v2024_v42  ;;  %v2493_v30 = vld [vmem:[#allocation3 + $0x3a8] sm:$0xff] }
 0x3d9   : > { %2607 = vmatpush1.bf16.msra.mxu0 %v2487_v24  ;;  %3048 = vmatprep.subr.bf16.mxu1 %v2051_v48  ;;  %v1896_v16 = vpop.permute.xlu1 %1895 }
 0x3da   : > { %3049 = vmatpush3.bf16.msra.mxu1 %v1915_v58  ;;  %2608 = vmatprep.subr.bf16.mxu0 %v2491_v52  ;;  %v1918_v39 = vsel %vm507_vm4, %v4361_v14, %v1896_v16 }
 0x3db   : > { %v2032_v19 = vpop.permute.xlu0 %2031 }
 0x3dc   : > { %v2054_v56 = vsel %vm645_vm7, %v4548_v21, %v2032_v19  ;;  %v4652_v21 = vld [vmem:[%s4723_s3 + $0x10] ss:$0 sps:$4 sm:$0xff]  }
 0x3dd   : > { %2609 = vmatpush1.bf16.msra.mxu0 %v2490_v5  ;;  %3050 = vmatprep.subr.bf16.mxu1 %v2054_v56  ;;  %v1904_v8 = vpop.permute.xlu1 %1903 }
 0x3de   : > { %3051 = vmatpush3.bf16.msra.mxu1 %v1918_v39  ;;  %2610 = vmatprep.subr.bf16.mxu0 %v2494_v27  ;;  %v1921_v6 = vsel %vm507_vm4, %v4393_v40, %v1904_v8 }
 0x3df   : > { %v2040_v18 = vpop.permute.xlu0 %2039 }
 0x3e0   : > { %v2057_v17 = vsel %vm645_vm7, %v4564_v31, %v2040_v18 }
 0x3e1   : > { %2611 = vmatpush1.bf16.msra.mxu0 %v2493_v30  ;;  %3052 = vmatprep.subr.bf16.mxu1 %v2057_v17  ;;  %v2048_v45 = vpop.permute.xlu1 %2047 }
 0x3e2   : > { %3053 = vmatpush3.bf16.msra.mxu1 %v1921_v6  ;;  %v2060_v31 = vsel %vm645_vm7, %v4574_v50, %v2048_v45  ;;  %v2770_v6 = vld [vmem:[%s3422_s11] sm:$0x7] }
 0x3e3   : > { %v2176_v14 = vpop.permute.xlu0 %2175  ;;  %3054 = vmatprep.subr.bf16.mxu1 %v2060_v31  ;;  %v2779_v31 = vrot.slane %v2770_v6, %v1716_v44 }
 0x3e4   : > { %v2203_v53 = vsel %vm799_vm9, %v4478_v35, %v2176_v14  ;;  %2629 = vmatmul.mubr.bf16.vlgmr.msra.gmra.mrb[4].mxu0 %v4652_v21  ;;  %v3344_v35 = vmov 0.0  }
 0x3e5   : > { %3062 = vmatprep.subr.bf16.mxu0 %v2203_v53  ;;  %2709 = vmatprep.mubr.bf16.mxu0 %v4417_v23  ;;  %v2184_v13 = vpop.permute.xlu1 %2183 }
 0x3e6   : > { %3063 = vmatpush3.bf16.msra.mxu0 %v2426_v25  ;;  %v2206_v63 = vsel %vm799_vm9, %v4501_v54, %v2184_v13 }
 0x3e7   : > { %v1912_v40 = vpop.permute.xlu0 %1911  ;;  %3064 = vmatprep.subr.bf16.mxu0 %v2206_v63 }
 0x3e8   : > { %v1924_v61 = vsel %vm507_vm4, %v4425_v57, %v1912_v40 }
 0x3e9   : > { %3055 = vmatpush3.bf16.msra.mxu1 %v1924_v61  ;;  %v2192_v59 = vpop.permute.xlu1 %2191 }
 0x3ea   : > { %3065 = vmatpush3.bf16.msra.mxu0 %v2429_v2  ;;  %3117 = vmatprep.subr.bf16.mxu1 %v3344_v35  ;;  %v2209_v38 = vsel %vm799_vm9, %v4522_v62, %v2192_v59 }
 0x3eb   : > { %v2312_v50 = vpop.permute.xlu0 %2311  ;;  %3066 = vmatprep.subr.bf16.mxu0 %v2209_v38 }
 0x3ec   : > { %v2339_v23 = vsel %vm937_vm5, %v4590_v33, %v2312_v50  ;;  %2670 = vmatmul.mubr.bf16.vlgmr.msra.gmra.mrb[4].mxu1 %v4581_v36 }
 0x3ed   : > { %3118 = vmatpush3.bf16.msra.mxu1 %v2339_v23  ;;  %v2200_v54 = vpop.permute.xlu1 %2199  ;;  %3133 = vmatprep.mubr.msk.bf16.mxu1 %vm3345_vm11, %v3344_v35 }
 0x3ee   : > { %3067 = vmatpush3.bf16.msra.mxu0 %v2432_v47  ;;  %3119 = vmatprep.subr.bf16.mxu1 %v3344_v35  ;;  %v2212_v33 = vsel %vm799_vm9, %v4539_v0, %v2200_v54  ;;  %v3346_v54 = vmov 1966171168  }
 0x3ef   : > { %v2320_v57 = vpop.permute.xlu0 %2319  ;;  %3068 = vmatprep.subr.bf16.mxu0 %v2212_v33 }
 0x3f0   : > { %v2342_v55 = vsel %vm937_vm5, %v4604_v11, %v2320_v57 }
 0x3f1   : > { %3120 = vmatpush3.bf16.msra.mxu1 %v2342_v55  ;;  %v2244_v36 = vpop.permute.xlu1 %2243 }
 0x3f2   : > { %3069 = vmatpush3.bf16.msra.mxu0 %v2435_v60  ;;  %3121 = vmatprep.subr.bf16.mxu1 %v3344_v35  ;;  %v2271_v28 = vsel %vm868_vm10, %v4555_v43, %v2244_v36  ;;  %v2795_v60 = vunpack.c.l.s4 %v3346_v54 }
 0x3f3   : > { %v2328_v62 = vpop.permute.xlu0 %2327  ;;  %3070 = vmatprep.subr.bf16.mxu0 %v2271_v28 }
 0x3f4   : > { %v2345_v20 = vsel %vm937_vm5, %v4615_v34, %v2328_v62 }
 0x3f5   : > { %3122 = vmatpush3.bf16.msra.mxu1 %v2345_v20  ;;  %v2336_v11 = vpop.permute.xlu1 %2335  ;;  %v2796_v20 = vunpack.c.0.s8 %v2795_v60 }
 0x3f6   : > { %3123 = vmatprep.subr.bf16.mxu1 %v3344_v35  ;;  %v2348_v1 = vsel %vm937_vm5, %v4624_v41, %v2336_v11 }
 0x3f7   : > { %v2108_v49 = vpop.permute.xlu0 %2107 }
 0x3f8   : > { %v2135_v0 = vsel %vm730_vm8, %v4370_v15, %v2108_v49  ;;  %v2489_v15 = vld [vmem:[#allocation3 + $0x388] sm:$0xff] }
 0x3f9   : > { %3071 = vmatpush3.bf16.msra.mxu0 %v2135_v0  ;;  %3124 = vmatpush3.bf16.msra.mxu1 %v2348_v1  ;;  %v2116_v34 = vpop.permute.xlu1 %2115  ;;  %v2783_v1 = vrot.slane %v2770_v6, %v1720_v26 }
 0x3fa   : > { %3125 = vmatprep.subr.bf16.mxu1 %v3344_v35  ;;  %v2138_v42 = vsel %vm730_vm8, %v4402_v37, %v2116_v34 }
 0x3fb   : > { %v2252_v24 = vpop.permute.xlu0 %2251 }
 0x3fc   : > { %v2274_v43 = vsel %vm868_vm10, %v4569_v7, %v2252_v24  ;;  %v2492_v7 = vld [vmem:[#allocation3 + $0x3a0] sm:$0xff]  ;;  %v2799_v24 = vsub.s32 %v2796_v20, %v4047_v12 }
 0x3fd   : > { %3072 = vmatprep.subr.bf16.mxu0 %v2274_v43  ;;  %3126 = vmatpush3.bf16.msra.mxu1 %v2486_v46  ;;  %v2124_v52 = vpop.permute.xlu1 %2123 }
 0x3fe   : > { %3073 = vmatpush3.bf16.msra.mxu0 %v2138_v42  ;;  %3127 = vmatprep.subr.bf16.mxu1 %v3344_v35  ;;  %v2141_v48 = vsel %vm730_vm8, %v4434_v51, %v2124_v52 }
 0x3ff   : > { %v2260_v4 = vpop.permute.xlu0 %2259 }
 0x400   : > { %v2277_v41 = vsel %vm868_vm10, %v4583_v9, %v2260_v4  ;;  %v2495_v9 = vld [vmem:[#allocation3 + $0x3b8] sm:$0xff] }
 0x401   : > { %3074 = vmatprep.subr.bf16.mxu0 %v2277_v41  ;;  %3128 = vmatpush3.bf16.msra.mxu1 %v2489_v15  ;;  %v2132_v37 = vpop.permute.xlu1 %2131 }
 0x402   : > { %3075 = vmatpush3.bf16.msra.mxu0 %v2141_v48  ;;  %3129 = vmatprep.subr.bf16.mxu1 %v3344_v35  ;;  %v2144_v19 = vsel %vm730_vm8, %v4456_v22, %v2132_v37 }
 0x403   : > { %v2268_v58 = vpop.permute.xlu0 %2267 }
 0x404   : > { %v2280_v5 = vsel %vm868_vm10, %v4594_v29, %v2268_v58 }
 0x405   : > { %3076 = vmatprep.subr.bf16.mxu0 %v2280_v5  ;;  %3130 = vmatpush3.bf16.msra.mxu1 %v2492_v7 }
 0x406   : > { %3077 = vmatpush3.bf16.msra.mxu0 %v2144_v19  ;;  %3131 = vmatprep.subr.bf16.mxu1 %v3344_v35 }
 0x409   : > { %2710 = vmatmul.mubr.bf16.vlgmr.msra.gmra.mrb[8].mxu0 %v4602_v32  ;;  %3132 = vmatpush3.bf16.msra.mxu1 %v2495_v9  ;;  %v2775_v32 = vrot.slane %v2770_v6, %v4059_v10 }
 0x40c   : > { %3134 = vmatmul.mubr.bf16.vlgmr.msra.gmra.mrb[8].mxu1 %v4652_v21 }
 0x414   : > { %v2761_v17 = vpop.permute.xlu0 %2760 }
 0x415   : > { %v2766_v14 = vrot.slane %v2761_v17, %v4059_v10 }
 0x478   : > { %v2548_v51 = vpop.f32.mrb[0].mxu0 }
 0x479   : > { %v2550_v16 = vpop.f32.mrb[1].mxu0 }
 0x47a   : > { %v2552_v27 = vpop.f32.mrb[2].mxu0 }
 0x47b   : > { %v2553_v56 = vpop.f32.mrb[3].mxu0 }
 0x48b   : > { %v2589_v39 = vpop.f32.mrb[0].mxu1 }
 0x48c   : > { %v2590_v29 = vadd.f32 %v2589_v39, %v2548_v51  ;;  %v2591_v30 = vpop.f32.mrb[1].mxu1 }
 0x48d   : > { %v2592_v18 = vadd.f32 %v2591_v30, %v2550_v16  ;;  %v2593_v22 = vpop.f32.mrb[2].mxu1 }
 0x48e   : > { %v2594_v8 = vpop.f32.mrb[3].mxu1 }
 0x4b7   : > { %v2630_v45 = vpop.f32.mrb[4].mxu0 }
 0x4b8   : > { %v2631_v25 = vadd.f32 %v2630_v45, %v2590_v29  ;;  %v2632_v53 = vpop.f32.mrb[5].mxu0 }
 0x4b9   : > { %v2633_v21 = vadd.f32 %v2632_v53, %v2592_v18  ;;  %v2634_v40 = vpop.f32.mrb[6].mxu0 }
 0x4ba   : > { %v2767_v13 = vadd.f32 %v2766_v14, %v2631_v25  ;;  %v2635_v2 = vpop.f32.mrb[7].mxu0 }
 0x4bb   : > { %v2768_v61 = vadd.f32 %v2766_v14, %v2633_v21 }
 0x4bc   : > { %v2787_v63 = vadd.f32 %v2775_v32, %v2767_v13 }
 0x4bd   : > { %v2788_v35 = vadd.f32 %v2779_v31, %v2768_v61 }
 0x4bf   : > { %v2793_v50 = vcombine.low %v2787_v63, %v2788_v35  ;;  %v3056_v59 = vpop.f32.mrb[4].mxu1 }
 0x4c0   : > { %v3057_v47 = vpop.f32.mrb[5].mxu1 }
 0x4c1   : > { %v3058_v23 = vadd.f32 %v3057_v47, %v3056_v59  ;;  %v3059_v38 = vpop.f32.mrb[6].mxu1  ;;  %v2800_v42 = vrot.slane %v2793_v50, %v2799_v24 }
 0x4c2   : > { %v3060_v57 = vpop.f32.mrb[7].mxu1 }
 0x4dc   : > { %v3078_v10 = vpop.f32.mrb[8].mxu0 }
 0x4dd   : > { %v3079_v55 = vpop.f32.mrb[9].mxu0 }
 0x4de   : > { %v3080_v33 = vadd.f32 %v3079_v55, %v3078_v10  ;;  %v3081_v62 = vpop.f32.mrb[10].mxu0 }
 0x4df   : > { %v3082_v36 = vpop.f32.mrb[11].mxu0  ;;  %v2751_v44 = vpop.f32.mrb[8].mxu1 }
 0x4e0   : > { %v2712_v28 = vadd.f32 %v3080_v33, %v3058_v23  ;;  %v3135_v49 = vpop.f32.mrb[9].mxu1 }
 0x4e1   : > { %v2754_v11 = vpop.f32.mrb[10].mxu1 }
 0x4e2   : > { %v2752_v0 = vadd.f32 %v2751_v44, %v2712_v28  ;;  %v3136_v46 = vpop.f32.mrb[11].mxu1 }
 0x4e4   : > { %v2769_v34 = vadd.f32 %v2766_v14, %v2752_v0 }
 0x4e6   : > { %v2789_v43 = vadd.f32 %v2783_v1, %v2769_v34 }
 0x4e8   : > { %v2807_v15 = vrot.slane %v2789_v43, %v2799_v24 }
 0x4ea   : > { %v2808_v4 = vcombine.low %v2800_v42, %v2807_v15 }
 0x4ec   : > { %v2815_v52 = vrot.slane %v2808_v4, %v2799_v24 }
 0x4ee   : > { %2821 = vst.msk [vmem:[%s3437_s20] sm:$0x7] %vm2819_vm12, %v2815_v52 }
 0x4ef PF: > { %s18_s27 = sadd.s32 1, %s3323_s27   ;;  %s4727_s23 = smov %s3315_s25 }
 0x4f0   : > { %p15_p9 = scmp.ge.s32.totalorder %s18_s27, 40   ;;  %s4728_s24 = smov %s3319_s26 }
 0x4f1   : > { %s4729_s25 = smov %s4732_s4  ;;  %s4730_s26 = smov %s4736_s28 }
 0x4f2   :  { %17 = sbr.rel (!%p15_p9) target bundleno = 3 (0x3), region = 88 }

</bundles_post_ra>
